<compile_context>
chip_gen: v6e
topology: v6e:2x2x1
jax: 0.10.0
libtpu: 0.0.40
codegen_flags: <defaults>
</compile_context>

<pallas_src>
import math
import functools

import jax
import jax.numpy as jnp
from jax import lax
from jax.experimental import pallas as pl
from jax.experimental.pallas import tpu as pltpu

NEG_INF = -1e30


# ------------------------- in-kernel helpers -------------------------

def _layer_norm(h, w, b, eps=1e-5):
    mu = jnp.mean(h, axis=-1, keepdims=True)
    var = jnp.mean(jnp.square(h - mu), axis=-1, keepdims=True)
    return (h - mu) * lax.rsqrt(var + eps) * w + b


def _gelu_exact(h):
    # nn.GELU() default = exact erf-based GELU
    return 0.5 * h * (1.0 + lax.erf(h * (1.0 / math.sqrt(2.0))))


# ------------------------- kernel 1: ln_1 + QKV projection -------------------------

def qkv_kernel(x_ref, ln1_w_ref, ln1_b_ref, w_attn_ref, b_attn_ref, qkv_ref):
    x = x_ref[0]                                          # (TR, C) f32
    h = _layer_norm(x, ln1_w_ref[0], ln1_b_ref[0])        # f32
    qkv = jnp.dot(h.astype(jnp.bfloat16), w_attn_ref[...],
                  preferred_element_type=jnp.float32) + b_attn_ref[0]
    qkv_ref[0] = qkv.astype(qkv_ref.dtype)                # bf16 out


# ------------- kernel 2: flash attention + proj + residual + ln_2 + MLP -------------

def attn_mlp_kernel(n_head, head_dim,
                    x_ref, q_ref, k_ref, v_ref,
                    w_proj_ref, b_proj_ref,
                    ln2_w_ref, ln2_b_ref,
                    w_fc_ref, b_fc_ref, w_mproj_ref, b_mproj_ref,
                    out_ref,
                    m_ref, l_ref, acc_ref):
    q_idx = pl.program_id(1)
    kv_idx = pl.program_id(2)
    tq = q_ref.shape[1]
    tk = k_ref.shape[1]
    scale = 1.0 / math.sqrt(head_dim)

    @pl.when(kv_idx == 0)
    def _init():
        m_ref[...] = jnp.full(m_ref.shape, -jnp.inf, dtype=m_ref.dtype)
        l_ref[...] = jnp.zeros(l_ref.shape, dtype=l_ref.dtype)
        acc_ref[...] = jnp.zeros(acc_ref.shape, dtype=acc_ref.dtype)

    # Causal: KV tiles strictly in the future contribute nothing -> skip compute.
    @pl.when(kv_idx <= q_idx)
    def _accumulate():
        q_all = q_ref[0]          # (tq, C) bf16
        k_all = k_ref[0]          # (tk, C) bf16
        v_all = v_ref[0]          # (tk, C) bf16

        # tile-local causal mask from grid offsets (shared across heads)
        row = q_idx * tq + lax.broadcasted_iota(jnp.int32, (tq, tk), 0)
        col = kv_idx * tk + lax.broadcasted_iota(jnp.int32, (tq, tk), 1)
        causal = col <= row

        for h in range(n_head):                           # static unrolled head loop
            sl = slice(h * head_dim, (h + 1) * head_dim)   # static lane slice
            s = lax.dot_general(q_all[:, sl], k_all[:, sl],
                                (((1,), (1,)), ((), ())),
                                preferred_element_type=jnp.float32) * scale
            s = jnp.where(causal, s, NEG_INF)              # (tq, tk) f32

            m_prev = m_ref[:, h:h + 1]                     # (tq, 1)
            l_prev = l_ref[:, h:h + 1]
            m_new = jnp.maximum(m_prev, jnp.max(s, axis=-1, keepdims=True))
            alpha = jnp.exp(m_prev - m_new)
            p = jnp.exp(s - m_new)
            m_ref[:, h:h + 1] = m_new
            l_ref[:, h:h + 1] = alpha * l_prev + jnp.sum(p, axis=-1, keepdims=True)

            pv = jnp.dot(p.astype(jnp.bfloat16), v_all[:, sl],
                         preferred_element_type=jnp.float32)
            acc_ref[:, sl] = alpha * acc_ref[:, sl] + pv

    # Diagonal tile is the last contributing KV tile: finalize + proj + MLP.
    @pl.when(kv_idx == q_idx)
    def _finalize():
        for h in range(n_head):
            sl = slice(h * head_dim, (h + 1) * head_dim)
            inv_l = pl.reciprocal(l_ref[:, h:h + 1], approx=True)
            acc_ref[:, sl] = acc_ref[:, sl] * inv_l
        y = acc_ref[...]                                   # (tq, C) f32, heads in lanes

        attn = jnp.dot(y.astype(jnp.bfloat16), w_proj_ref[...],
                       preferred_element_type=jnp.float32) + b_proj_ref[0]
        x1 = x_ref[0] + attn                               # residual 1 (f32)

        h2 = _layer_norm(x1, ln2_w_ref[0], ln2_b_ref[0])
        ff = jnp.dot(h2.astype(jnp.bfloat16), w_fc_ref[...],
                     preferred_element_type=jnp.float32) + b_fc_ref[0]
        ff = _gelu_exact(ff)
        ff = jnp.dot(ff.astype(jnp.bfloat16), w_mproj_ref[...],
                     preferred_element_type=jnp.float32) + b_mproj_ref[0]
        out_ref[0] = (x1 + ff).astype(out_ref.dtype)       # residual 2


# ------------------------- wrapper -------------------------

def _nbytes(shape, dtype):
    n = 1
    for s in shape:
        n *= int(s)
    return n * jnp.dtype(dtype).itemsize


def _compiler_params(dimension_semantics, vmem_need_bytes):
    kwargs = dict(dimension_semantics=dimension_semantics)
    # Raise scoped-VMEM limit only when the footprint exceeds the most
    # conservative default (v5e: 16 MiB); cap well below physical VMEM
    # (v7x has only 64 MiB) to leave compiler headroom.
    if vmem_need_bytes > 14 * 1024 * 1024:
        try:
            cap = int(pltpu.get_tpu_info().vmem_capacity_bytes)
        except Exception:
            cap = 64 * 1024 * 1024
        kwargs["vmem_limit_bytes"] = int(min(vmem_need_bytes * 5 // 4, cap * 3 // 4))
    return pltpu.CompilerParams(**kwargs)


def block_forward(x, params, n_head, *, tq=128):
    B, T, C = x.shape
    assert C % n_head == 0, "n_embd must be divisible by n_head"
    hd = C // n_head
    assert C % 128 == 0, "pad n_embd to a multiple of 128 lanes"
    assert T % 8 == 0, "pad sequence length to a multiple of 8 sublanes"

    # pick a query/kv tile that divides T (multiple of 8)
    tq = min(tq, T)
    while T % tq != 0:
        tq //= 2
    assert tq >= 8 and tq % 8 == 0, "could not find an 8-aligned tile dividing T"
    tk = tq
    nq, nkv = T // tq, T // tk

    f32, bf16 = jnp.float32, jnp.bfloat16
    # bf16 weights: feeds MXU at full rate and halves resident weight VMEM.
    w_attn = params['w_attn'].astype(bf16)
    w_proj = params['w_proj'].astype(bf16)
    w_fc = params['w_fc'].astype(bf16)
    w_mproj = params['w_mproj'].astype(bf16)

    # ---------------- kernel 1: ln_1 + QKV ----------------
    k1_need = 2 * (_nbytes((tq, C), f32) + 2 * _nbytes((1, C), f32)
                   + _nbytes((C, 3 * C), bf16) + _nbytes((1, 3 * C), f32)
                   + _nbytes((tq, 3 * C), bf16))
    qkv = pl.pallas_call(
        qkv_kernel,
        out_shape=jax.ShapeDtypeStruct((B, T, 3 * C), bf16),
        grid_spec=pltpu.PrefetchScalarGridSpec(
            num_scalar_prefetch=0,
            grid=(B, nq),
            in_specs=[
                pl.BlockSpec((1, tq, C), lambda b, r: (b, r, 0)),      # x tile
                pl.BlockSpec((1, C), lambda b, r: (0, 0)),             # ln1 w
                pl.BlockSpec((1, C), lambda b, r: (0, 0)),             # ln1 b
                pl.BlockSpec((C, 3 * C), lambda b, r: (0, 0)),         # w_attn
                pl.BlockSpec((1, 3 * C), lambda b, r: (0, 0)),         # b_attn
            ],
            out_specs=pl.BlockSpec((1, tq, 3 * C), lambda b, r: (b, r, 0)),
        ),
        compiler_params=_compiler_params(("parallel", "parallel"), k1_need),
    )(x, params['ln1_w'], params['ln1_b'], w_attn, params['b_attn'])

    # ------- kernel 2: flash attention + proj + residual + ln_2 + MLP -------
    k2_need = (2 * (_nbytes((tq, C), f32)                 # x tile
                    + 3 * _nbytes((tq, C), bf16)          # q/k/v tiles
                    + _nbytes((C, C), bf16) + _nbytes((C, 4 * C), bf16)
                    + _nbytes((4 * C, C), bf16)
                    + 5 * _nbytes((1, C), f32) + _nbytes((1, 4 * C), f32)
                    + _nbytes((tq, C), f32))              # out tile
               + _nbytes((tq, C), f32) + 2 * _nbytes((tq, n_head), f32))  # scratch

    out = pl.pallas_call(
        functools.partial(attn_mlp_kernel, n_head, hd),
        out_shape=jax.ShapeDtypeStruct((B, T, C), x.dtype),
        grid_spec=pltpu.PrefetchScalarGridSpec(
            num_scalar_prefetch=0,
            grid=(B, nq, nkv),
            in_specs=[
                pl.BlockSpec((1, tq, C), lambda b, q, kv: (b, q, 0)),   # x (residual)
                pl.BlockSpec((1, tq, C), lambda b, q, kv: (b, q, 0)),   # Q  (qkv lanes 0:C)
                pl.BlockSpec((1, tk, C), lambda b, q, kv: (b, kv, 1)),  # K  (qkv lanes C:2C)
                pl.BlockSpec((1, tk, C), lambda b, q, kv: (b, kv, 2)),  # V  (qkv lanes 2C:3C)
                pl.BlockSpec((C, C), lambda b, q, kv: (0, 0)),          # w_proj
                pl.BlockSpec((1, C), lambda b, q, kv: (0, 0)),          # b_proj
                pl.BlockSpec((1, C), lambda b, q, kv: (0, 0)),          # ln2 w
                pl.BlockSpec((1, C), lambda b, q, kv: (0, 0)),          # ln2 b
                pl.BlockSpec((C, 4 * C), lambda b, q, kv: (0, 0)),      # w_fc
                pl.BlockSpec((1, 4 * C), lambda b, q, kv: (0, 0)),      # b_fc
                pl.BlockSpec((4 * C, C), lambda b, q, kv: (0, 0)),      # w_mproj
                pl.BlockSpec((1, C), lambda b, q, kv: (0, 0)),          # b_mproj
            ],
            out_specs=pl.BlockSpec((1, tq, C), lambda b, q, kv: (b, q, 0)),
            scratch_shapes=[
                pltpu.VMEM((tq, n_head), jnp.float32),   # m (running max, per head)
                pltpu.VMEM((tq, n_head), jnp.float32),   # l (running denom, per head)
                pltpu.VMEM((tq, C), jnp.float32),        # acc (per-head outputs in lanes)
            ],
        ),
        compiler_params=_compiler_params(("parallel", "parallel", "arbitrary"), k2_need),
    )(x, qkv, qkv, qkv,
      w_proj, params['b_proj'],
      params['ln2_w'], params['ln2_b'],
      w_fc, params['b_fc'], w_mproj, params['b_mproj'])

    return out


# ------------------------- pure-JAX reference (f32) -------------------------

def block_ref(x, params, n_head):
    def ln(h, w, b):
        mu = h.mean(-1, keepdims=True)
        var = ((h - mu) ** 2).mean(-1, keepdims=True)
        return (h - mu) / jnp.sqrt(var + 1e-5) * w + b

    B, T, C = x.shape
    hd = C // n_head
    h = ln(x, params['ln1_w'][0], params['ln1_b'][0])
    qkv = h @ params['w_attn'] + params['b_attn'][0]
    q, k, v = jnp.split(qkv, 3, axis=-1)
    q = q.reshape(B, T, n_head, hd).transpose(0, 2, 1, 3)
    k = k.reshape(B, T, n_head, hd).transpose(0, 2, 1, 3)
    v = v.reshape(B, T, n_head, hd).transpose(0, 2, 1, 3)
    s = jnp.einsum('bhtd,bhsd->bhts', q, k) / math.sqrt(hd)
    mask = jnp.tril(jnp.ones((T, T), bool))
    s = jnp.where(mask, s, -jnp.inf)
    p = jax.nn.softmax(s, axis=-1)
    y = jnp.einsum('bhts,bhsd->bhtd', p, v)
    y = y.transpose(0, 2, 1, 3).reshape(B, T, C)
    y = y @ params['w_proj'] + params['b_proj'][0]
    x1 = x + y
    h2 = ln(x1, params['ln2_w'][0], params['ln2_b'][0])
    m = h2 @ params['w_fc'] + params['b_fc'][0]
    m = jax.nn.gelu(m, approximate=False)
    m = m @ params['w_mproj'] + params['b_mproj'][0]
    return x1 + m


# ------------------------- main -------------------------

if __name__ == "__main__":
    # small, lane-aligned GPT-style config (bias=True, dropout=0):
    # C multiple of 128, head_dim = 128, T multiple of the 128 query tile.
    B, T, C, n_head = 2, 256, 256, 2

    key = jax.random.PRNGKey(0)
    keys = jax.random.split(key, 9)
    std = 0.02
    params = {
        'ln1_w':   jnp.ones((1, C), jnp.float32),
        'ln1_b':   jnp.zeros((1, C), jnp.float32),
        'w_attn':  std * jax.random.normal(keys[0], (C, 3 * C), jnp.float32),
        'b_attn':  std * jax.random.normal(keys[1], (1, 3 * C), jnp.float32),
        'w_proj':  std * jax.random.normal(keys[2], (C, C), jnp.float32),
        'b_proj':  std * jax.random.normal(keys[3], (1, C), jnp.float32),
        'ln2_w':   jnp.ones((1, C), jnp.float32),
        'ln2_b':   jnp.zeros((1, C), jnp.float32),
        'w_fc':    std * jax.random.normal(keys[4], (C, 4 * C), jnp.float32),
        'b_fc':    std * jax.random.normal(keys[5], (1, 4 * C), jnp.float32),
        'w_mproj': std * jax.random.normal(keys[6], (4 * C, C), jnp.float32),
        'b_mproj': std * jax.random.normal(keys[7], (1, C), jnp.float32),
    }
    x = jax.random.normal(keys[8], (B, T, C), jnp.float32)

    out = jax.block_until_ready(block_forward(x, params, n_head))
    ref = jax.block_until_ready(block_ref(x, params, n_head))

    assert out.shape == (B, T, C)
    max_diff = jnp.max(jnp.abs(out - ref))
    # kernel uses bf16 matmul inputs with f32 accumulation -> small numeric delta
    assert jnp.allclose(out, ref, atol=3e-2, rtol=3e-2), f"max abs diff {max_diff}"
    print("KERNEL_OK")
</pallas_src>

<mosaic_0001>
module attributes {stable_mosaic.version = 11 : i64} {
  func.func @qkv_kernel(%arg0: i32, %arg1: i32, %arg2: memref<1x128x256xf32, #tpu.memory_space<vmem>>, %arg3: memref<1x256xf32, #tpu.memory_space<vmem>>, %arg4: memref<1x256xf32, #tpu.memory_space<vmem>>, %arg5: memref<256x768xbf16, #tpu.memory_space<vmem>>, %arg6: memref<1x768xf32, #tpu.memory_space<vmem>>, %arg7: memref<1x128x768xbf16, #tpu.memory_space<vmem>>) attributes {dimension_semantics = [#tpu.dimension_semantics<parallel>, #tpu.dimension_semantics<parallel>], iteration_bounds = array<i64: 2, 2>, scalar_prefetch = 0 : i64, scratch_operands = 0 : i64, tpu.core_type = #tpu.core_type<tc>, window_params = [{transform_indices = @transform_0, window_bounds = array<i64: 1, 128, 256>}, {pipeline_mode = #tpu.pipeline_mode<synchronous>, transform_indices = @transform_1, window_bounds = array<i64: 1, 256>}, {pipeline_mode = #tpu.pipeline_mode<synchronous>, transform_indices = @transform_2, window_bounds = array<i64: 1, 256>}, {pipeline_mode = #tpu.pipeline_mode<synchronous>, transform_indices = @transform_3, window_bounds = array<i64: 256, 768>}, {pipeline_mode = #tpu.pipeline_mode<synchronous>, transform_indices = @transform_4, window_bounds = array<i64: 1, 768>}, {transform_indices = @transform_5, window_bounds = array<i64: 1, 128, 768>}]} {
    %c0 = arith.constant 0 : index
    %c0_0 = arith.constant 0 : index
    %c0_1 = arith.constant 0 : index
    %0 = vector.load %arg2[%c0, %c0_0, %c0_1] : memref<1x128x256xf32, #tpu.memory_space<vmem>>, vector<1x128x256xf32>
    %1 = vector.shape_cast %0 : vector<1x128x256xf32> to vector<128x256xf32>
    %c0_2 = arith.constant 0 : index
    %c0_3 = arith.constant 0 : index
    %2 = vector.load %arg3[%c0_2, %c0_3] : memref<1x256xf32, #tpu.memory_space<vmem>>, vector<1x256xf32>
    %3 = vector.shape_cast %2 : vector<1x256xf32> to vector<256xf32>
    %c0_4 = arith.constant 0 : index
    %c0_5 = arith.constant 0 : index
    %4 = vector.load %arg4[%c0_4, %c0_5] : memref<1x256xf32, #tpu.memory_space<vmem>>, vector<1x256xf32>
    %5 = vector.shape_cast %4 : vector<1x256xf32> to vector<256xf32>
    %cst = arith.constant dense<0.000000e+00> : vector<128xf32>
    %6 = vector.multi_reduction <add>, %1, %cst [1] : vector<128x256xf32> to vector<128xf32>
    %7 = vector.shape_cast %6 : vector<128xf32> to vector<128x1xf32>
    %cst_6 = arith.constant 2.560000e+02 : f32
    %8 = vector.broadcast %cst_6 : f32 to vector<128x1xf32>
    %9 = arith.divf %7, %8 : vector<128x1xf32>
    %10 = vector.broadcast %9 : vector<128x1xf32> to vector<128x256xf32>
    %11 = arith.subf %1, %10 : vector<128x256xf32>
    %12 = arith.mulf %11, %11 : vector<128x256xf32>
    %cst_7 = arith.constant dense<0.000000e+00> : vector<128xf32>
    %13 = vector.multi_reduction <add>, %12, %cst_7 [1] : vector<128x256xf32> to vector<128xf32>
    %14 = vector.shape_cast %13 : vector<128xf32> to vector<128x1xf32>
    %cst_8 = arith.constant 2.560000e+02 : f32
    %15 = vector.broadcast %cst_8 : f32 to vector<128x1xf32>
    %16 = arith.divf %14, %15 : vector<128x1xf32>
    %17 = vector.broadcast %9 : vector<128x1xf32> to vector<128x256xf32>
    %18 = arith.subf %1, %17 : vector<128x256xf32>
    %cst_9 = arith.constant 9.99999974E-6 : f32
    %19 = vector.broadcast %cst_9 : f32 to vector<128x1xf32>
    %20 = arith.addf %16, %19 : vector<128x1xf32>
    %21 = math.rsqrt %20 : vector<128x1xf32>
    %22 = vector.broadcast %21 : vector<128x1xf32> to vector<128x256xf32>
    %23 = arith.mulf %18, %22 : vector<128x256xf32>
    %24 = vector.shape_cast %3 : vector<256xf32> to vector<1x256xf32>
    %25 = vector.broadcast %24 : vector<1x256xf32> to vector<128x256xf32>
    %26 = arith.mulf %23, %25 : vector<128x256xf32>
    %27 = vector.shape_cast %5 : vector<256xf32> to vector<1x256xf32>
    %28 = vector.broadcast %27 : vector<1x256xf32> to vector<128x256xf32>
    %29 = arith.addf %26, %28 : vector<128x256xf32>
    %30 = arith.truncf %29 : vector<128x256xf32> to vector<128x256xbf16>
    %c0_10 = arith.constant 0 : index
    %c0_11 = arith.constant 0 : index
    %31 = vector.load %arg5[%c0_10, %c0_11] : memref<256x768xbf16, #tpu.memory_space<vmem>>, vector<256x768xbf16>
    %cst_12 = arith.constant dense<0.000000e+00> : vector<128x768xf32>
    %32 = tpu.matmul %30, %31, %cst_12 {dimension_numbers = #tpu.dot_dimension_numbers<[1], [0], [0], [1], [0, 0, 1, 1], [], []>} : vector<128x256xbf16>, vector<256x768xbf16>, vector<128x768xf32> -> vector<128x768xf32>
    %c0_13 = arith.constant 0 : index
    %c0_14 = arith.constant 0 : index
    %33 = vector.load %arg6[%c0_13, %c0_14] : memref<1x768xf32, #tpu.memory_space<vmem>>, vector<1x768xf32>
    %34 = vector.shape_cast %33 : vector<1x768xf32> to vector<768xf32>
    %35 = vector.shape_cast %34 : vector<768xf32> to vector<1x768xf32>
    %36 = vector.broadcast %35 : vector<1x768xf32> to vector<128x768xf32>
    %37 = arith.addf %32, %36 : vector<128x768xf32>
    %38 = arith.truncf %37 : vector<128x768xf32> to vector<128x768xbf16>
    %c0_15 = arith.constant 0 : index
    %c0_16 = arith.constant 0 : index
    %c0_17 = arith.constant 0 : index
    %39 = vector.load %arg7[%c0_15, %c0_16, %c0_17] : memref<1x128x768xbf16, #tpu.memory_space<vmem>>, vector<1x128x768xbf16>
    %40 = vector.shape_cast %39 : vector<1x128x768xbf16> to vector<128x768xbf16>
    %41 = vector.shape_cast %38 : vector<128x768xbf16> to vector<1x128x768xbf16>
    tpu.vector_store %arg7[%c0_15, %c0_16, %c0_17], %41 {strides = array<i32>} : memref<1x128x768xbf16, #tpu.memory_space<vmem>>, vector<1x128x768xbf16>,
    return
  }
  func.func @transform_0(%arg0: i32, %arg1: i32) -> (i32, i32, i32) {
    %c0_i32 = arith.constant 0 : i32
    %c0_i32_0 = arith.constant 0 : i32
    return %arg0, %arg1, %c0_i32 : i32, i32, i32
  }
  func.func @transform_1(%arg0: i32, %arg1: i32) -> (i32, i32) {
    %c0_i32 = arith.constant 0 : i32
    %c0_i32_0 = arith.constant 0 : i32
    %c0_i32_1 = arith.constant 0 : i32
    return %c0_i32, %c0_i32_0 : i32, i32
  }
  func.func @transform_2(%arg0: i32, %arg1: i32) -> (i32, i32) {
    %c0_i32 = arith.constant 0 : i32
    %c0_i32_0 = arith.constant 0 : i32
    %c0_i32_1 = arith.constant 0 : i32
    return %c0_i32, %c0_i32_0 : i32, i32
  }
  func.func @transform_3(%arg0: i32, %arg1: i32) -> (i32, i32) {
    %c0_i32 = arith.constant 0 : i32
    %c0_i32_0 = arith.constant 0 : i32
    %c0_i32_1 = arith.constant 0 : i32
    return %c0_i32, %c0_i32_0 : i32, i32
  }
  func.func @transform_4(%arg0: i32, %arg1: i32) -> (i32, i32) {
    %c0_i32 = arith.constant 0 : i32
    %c0_i32_0 = arith.constant 0 : i32
    %c0_i32_1 = arith.constant 0 : i32
    return %c0_i32, %c0_i32_0 : i32, i32
  }
  func.func @transform_5(%arg0: i32, %arg1: i32) -> (i32, i32, i32) {
    %c0_i32 = arith.constant 0 : i32
    %c0_i32_0 = arith.constant 0 : i32
    return %arg0, %arg1, %c0_i32 : i32, i32, i32
  }
}

</mosaic_0001>

<bundles_post_ra>
// kernel: tpu_custom_call.1
= control target key start
LH: loop header
LB: loop body
LE: loop exit
PB: predicated region body
PF: predicated region fallthrough
CT: control target
= control target key end

     0   :  { %s3793_s0 = inlined_call_operand.hbm [shape: f32[2,256,256], index: 0, kind: input, shape index: {}]   ;;  %s3794_s1 = inlined_call_operand.hbm [shape: f32[1,256], index: 1, kind: input, shape index: {}]   ;;  %s3795_s2 = inlined_call_operand.hbm [shape: f32[1,256], index: 2, kind: input, shape index: {}]   ;;  %s3796_s3 = inlined_call_operand.hbm [shape: bf16[256,768], index: 3, kind: input, shape index: {}]   ;;  %s3797_s4 = inlined_call_operand.vmem [shape: f32[1,768], index: 4, kind: input, shape index: {}]   ;;  %s3798_s5 = inlined_call_operand.hbm [shape: bf16[2,256,768], index: 5, kind: output, shape index: {}]  }
   0x1   :  { %3807 = sst [smem:[#allocation19_spill]] %s3794_s1 }
   0x2   :  { %3808 = sst [smem:[#allocation20_spill]] %s3795_s2 }
   0x3   :  { %3809 = sst [smem:[#allocation21_spill]] %s3796_s3 }
   0x4   :  { %10 = vsyncpa [#allocation3], 0 }
   0x5   :  { %12 = vsyncpa [#allocation3 + $0x1], 0 }
   0x6   :  { %13 = vsyncpa [#allocation6], 0 }
   0x7   :  { %14 = vsyncpa [#allocation9], 0 }
   0x8   :  { %15 = vsyncpa [#allocation4], 0 }
   0x9   :  { %17 = vsyncpa [#allocation4 + $0x1], 0  ;;  %s2910_s18 = smov 0   ;;  %s2912_s19 = smov 0  }
   0xa   :  { %s2914_s20 = smov 0   ;;  %s2916_s21 = smov 0  }
   0xb   :  { %s2918_s22 = smov 0   ;;  %s2920_s23 = smov 0  }
   0xc   :  { %s2922_s24 = smov 0   ;;  %s2924_s25 = smov 0  }
   0xd LB: > { %3810 = sst [smem:[#allocation15_spill]] %s2839_s18  ;;  %s2116_s26 = sadd.s32 4294967295, %s2867_s25   ;;  %s2867_s25 = sphi %s2924_s25, %s23_s25   ;;  %s2863_s24 = sphi %s2922_s24, %s3839_s24   ;;  %s2859_s23 = sphi %s2920_s23, %s3834_s23   ;;  %s2855_s22 = sphi %s2918_s22, %s3838_s22   ;;  %s2851_s21 = sphi %s2916_s21, %s3833_s21   ;;  %s2847_s20 = sphi %s2914_s20, %s3837_s20   ;;  %s2843_s19 = sphi %s2912_s19, %s3836_s19   ;;  %s2839_s18 = sphi %s2910_s18, %s3835_s18  }
   0xe   : > { %3811 = sst [smem:[#allocation16_spill]] %s2859_s23  ;;  %s2117_s27 = sadd.s32 4294967294, %s2867_s25  }
   0xf   : > { %p57_p0 = scmp.ne.s32.totalorder %s2843_s19, %s2839_s18  ;;  %p2954_p1 = scmp.eq.s32.totalorder %s2116_s26, 0 }
  0x10   : > { %p2958_p2 = scmp.eq.s32.totalorder %s2116_s26, 3  ;;  %p173_p3 = scmp.eq.s32.totalorder %s2117_s27, 3 }
  0x11   : > { %s3812_s28 = scalar_select %p2954_p1, 1, 0 }
  0x12   : > { %s3813_s29 = scalar_select %p2958_p2, 1, 0 }
  0x13   : > { %p2964_p4 = por %p2954_p1, %p57_p0  ;;  %p2118_p5 = scmp.ge.s32.totalorder %s2867_s25, 1 }
  0x14   : > { %p2969_p6 = por %p173_p3, %p57_p0  ;;  %p180_p7 = scmp.lt.s32.totalorder %s2867_s25, 5 }
  0x15   : > { %s3814_s30 = scalar_select %p2964_p4, 1, 0 }
  0x16   : > { %s3815_s6 = scalar_select %p2969_p6, 1, 0 }
  0x17   : > { %p2974_p8 = pnand %p2118_p5, %p180_p7  ;;  %s2869_s8 = smov [#allocation5]  }
  0x18   : > { %3816 = sst [smem:[#allocation17_spill]] %s3815_s6  ;;  %s193_s9 = sshll.u32 %s2869_s8, 4  ;;  %s194_s9 = int_to_ptr.vmem [resolvable:$true] %s193_s9 }
  0x19   : > { %s3817_s7 = scalar_select %p2974_p8, 1, 0 }
  0x1a   : > { %p2382_p9 = pneg %p2974_p8  ;;  %s2870_s10 = smov [#allocation7]  }
  0x1b   : > { %s204_s11 = sshll.u32 %s2870_s10, 4  ;;  %s2871_s13 = smov [#allocation8]   ;;  %s205_s11 = int_to_ptr.vmem [resolvable:$true] %s204_s11 }
  0x1c   : > { %p2982_p10 = pnand %p2382_p9, %p2954_p1  ;;  %s214_s14 = sshll.u32 %s2871_s13, 4  ;;  %s2986_s14 = int_to_ptr.vmem [resolvable:$true] %s214_s14 }
  0x1d   : > { %s2668_s15 = scalar_lea.vmem %s194_s9, 32  ;;  %p2676_p3 = scmp.lt.s32.totalorder %s194_s9, %s194_s9 }
  0x1e   : > { %p2659_p11 = pneg %p2982_p10  ;;  %p2669_p12 = scmp.ne.s32.totalorder %s194_s9, %s2668_s15 }
  0x1f   : > { %p2677_p5 = scmp.lt.s32.totalorder %s2668_s15, %s2668_s15 }
  0x20   : > { %p2671_p13 = pnand %p2669_p12, %p2659_p11 }
  0x21   : > { %p2678_p7 = por %p2677_p5, %p2676_p3 }
  0x22   : > { %p2672_p0 = pneg %p2671_p13 }
  0x24   : > { %p2679_p9 = pnand %p2678_p7, %p2672_p0 }
  0x26   : > { %2682 = shalt.err (!%p2679_p9)
}
  0x27   : > { %s3819_s1 = sld [smem:[#allocation19_spill]]  ;;  %s2694_s26 = scalar_lea.vmem %s205_s11, 32 }
  0x28   : > { %p2695_p6 = scmp.ne.s32.totalorder %s205_s11, %s2694_s26  ;;  %p2702_p12 = scmp.lt.s32.totalorder %s205_s11, %s205_s11 }
  0x29   : > { %p2703_p13 = scmp.lt.s32.totalorder %s2694_s26, %s2694_s26 }
  0x2a   : > { %p2697_p1 = pnand %p2695_p6, %p2659_p11 }
  0x2b   : > { %p2704_p8 = por %p2703_p13, %p2702_p12 }
  0x2c   : > { %p2698_p4 = pneg %p2697_p1 }
  0x2d   : > { %2385 = dma.hbm_to_vmem [thread:$0]  (!%p2982_p10), %s3819_s1, 32, %s194_s9, [#allocation6]  }
  0x2e   : > { %p2705_p2 = pnand %p2704_p8, %p2698_p4 }
  0x30   : > { %2708 = shalt.err (!%p2705_p2)
}
  0x31   : > { %s3820_s2 = sld [smem:[#allocation20_spill]]  ;;  %s2720_s9 = scalar_lea.vmem %s2986_s14, 12288 }
  0x32   : > { %p2721_p0 = scmp.ne.s32.totalorder %s2986_s14, %s2720_s9  ;;  %p2728_p3 = scmp.lt.s32.totalorder %s2986_s14, %s2986_s14 }
  0x33   : > { %p2729_p4 = scmp.lt.s32.totalorder %s2720_s9, %s2720_s9 }
  0x34   : > { %p2723_p1 = pnand %p2721_p0, %p2659_p11 }
  0x35   : > { %p2730_p2 = por %p2729_p4, %p2728_p3 }
  0x36   : > { %p2724_p6 = pneg %p2723_p1 }
  0x37   : > { %2388 = dma.hbm_to_vmem [thread:$0]  (!%p2982_p10), %s3820_s2, 32, %s205_s11, [#allocation6]  }
  0x38   : > { %p2731_p8 = pnand %p2730_p2, %p2724_p6 }
  0x3a   : > { %2734 = shalt.err (!%p2731_p8)
}
  0x3b   : > { %s2872_s10 = smov 384   ;;  %s2873_s11 = smov 24  }
  0x3c   : > { %s3821_s3 = sld [smem:[#allocation21_spill]]  ;;  %s32_s16 = sadd.s32 1, %s2859_s23 }
  0x3d   : > { %p33_p11 = scmp.ge.s32.totalorder %s32_s16, 2  ;;  %s35_s17 = sadd.s32 1, %s2863_s24 }
  0x3e   : > { %s44_s26 = sadd.s32 1, %s2847_s20  ;;  %p51_p5 = scmp.ne.s32.totalorder %s2847_s20, %s2843_s19 }
  0x3f   : > { %s3841_s16 = smov (%p33_p11, %s32_s16), 0  ;;  %s3843_s17 = smov (!%p33_p11, %s35_s17), %s2863_s24 }
  0x40   : > { %3822 = sst [smem:[#allocation18_spill]] %s3841_s16  ;;  %s40_s27 = ssub.s32 %s2859_s23, %s3841_s16 }
  0x41   : > { %p52_p7 = scmp.eq.s32.totalorder %s2867_s25, 0  ;;  %p37_p9 = scmp.ge.s32.totalorder %s3843_s17, 2 }
  0x42   : > { %2391 = dma.hbm_to_vmem [thread:$0]  (!%p2982_p10), %s3821_s3, 12288, %s2986_s14, [#allocation9], %s2872_s10, %s2872_s10, %s2873_s11  }
  0x43   : > { %p3823_p12 = scmp.ne.s32.totalorder %s3813_s29, 0  ;;  %p3036_p10 = por %p52_p7, %p51_p5 }
  0x44   : > { %p2403_p0 = scmp.lt.s32.totalorder %s2867_s25, 4  ;;  %s3845_s17 = smov (%p37_p9, %s3843_s17), 0 }
  0x45   : > { %p3032_p13 = por %p3823_p12, %p51_p5  ;;  %s231_s8 = sand.u32 1, %s2847_s20  }
  0x46   : > { %s2282_s9 = sshll.u32 %s2859_s23, 5  ;;  %s39_s10 = ssub.s32 %s2863_s24, %s3845_s17 }
  0x47   : > { %s41_s11 = sor.u32 %s40_s27, %s39_s10  ;;  %s2123_s13 = sshll.u32 %s231_s8, 8 }
  0x48   : > { %p42_p1 = scmp.eq.s32.totalorder %s41_s11, 0  ;;  %s2126_s29 = sshll.u32 %s2863_s24, 6 }
  0x49   : > { %s235_s15 = scalar_lea.vmem [#allocation2], %s2123_s13  ;;  %s242_s3 = sadd.s32 %s2282_s9, %s2126_s29 }
  0x4a   : > { %s245_s1 = sshll.u32 %s235_s15, 4  ;;  %s2127_s16 = sshll.u32 %s242_s3, 7  ;;  %s246_s1 = int_to_ptr.vmem [resolvable:$true] %s245_s1 }
  0x4b   : > { %s3049_s2 = scalar_select %p42_p1, %s2847_s20, %s44_s26  }
  0x4c   : > { %p3055_p6 = pnand %p2403_p0, %p3036_p10  ;;  %s244_s27 = scalar_lea.hbm %s3793_s0, %s2127_s16 }
  0x4d   : > { %s232_s10 = scalar_lea.sflag [#allocation3], %s231_s8  ;;  %s2748_s11 = scalar_lea.vmem %s246_s1, 4096 }
  0x4e   : > { %p2737_p3 = pneg %p3055_p6  ;;  %p2749_p4 = scmp.ne.s32.totalorder %s246_s1, %s2748_s11 }
  0x4f   : > { %s2874_s26 = smov [#allocation2]  }
  0x50   : > { %p2751_p2 = pnand %p2749_p4, %p2737_p3  ;;  %s2753_s3 = sshll.u32 %s2874_s26, 4  ;;  %s2754_s3 = int_to_ptr.vmem [resolvable:$false] %s2753_s3 }
  0x51   : > { %s2755_s14 = scalar_lea.vmem %s2754_s3, 8192  ;;  %p2756_p11 = scmp.lt.s32.totalorder %s246_s1, %s2754_s3 }
  0x52   : > { %p2752_p8 = pneg %p2751_p2  ;;  %p2757_p5 = scmp.lt.s32.totalorder %s2755_s14, %s2748_s11 }
  0x54   : > { %p2758_p7 = por %p2757_p5, %p2756_p11 }
  0x56   : > { %p2759_p9 = pnand %p2758_p7, %p2752_p8 }
  0x58   : > { %2762 = shalt.err (!%p2759_p9)
}
  0x59   : > { %s2875_s9 = smov 256   ;;  %s2876_s18 = smov 16  }
  0x5a   : > { %2395 = dma.hbm_to_vmem [thread:$0]  (!%p3055_p6), %s244_s27, 4096, %s246_s1, %s232_s10, %s2875_s9, %s2875_s9, %s2876_s18  }
  0x5b   : > { %p3827_p12 = scmp.ne.s32.totalorder %s3817_s7, 0 }
  0x5c   : > { %s3069_s23 = sand.u32 (!%p3827_p12), 1, %s2843_s19   ;;  %p3828_p10 = scmp.ne.s32.totalorder (!%p3827_p12), %s3814_s30, 0 }
  0x5d   : > { %257 = sbr.rel (%p3827_p12) target bundleno = 727 (0x2d7), region = 40  ;;  %s2129_s16 = sshll.u32 (!%p3827_p12), %s3069_s23, 8 }
  0x5e   : > { %s260_s8 = scalar_lea.sflag (!%p3827_p12), [#allocation3], %s3069_s23  ;;  %s3073_s13 = scalar_lea.vmem (!%p3827_p12), [#allocation2], %s2129_s16 }
  0x62   : > { %2822 = dma.done.wait (%p3828_p10), %s260_s8, 4096  }
  0x63   : > { %2824 = vsyncadd (%p3828_p10), %s260_s8, 4294963200  ;;  %p3829_p0 = scmp.ne.s32.totalorder %s3812_s28, 0 }
  0x65   : > { %2826 = dma.done.wait (%p3829_p0), [#allocation6], 64  }
  0x66   : > { %2828 = vsyncadd (%p3829_p0), [#allocation6], 4294967232 }
  0x67   : > { %2830 = dma.done.wait (%p3829_p0), [#allocation9], 12288  }
  0x68   : > { %2832 = vsyncadd (%p3829_p0), [#allocation9], 4294955008  ;;  %v3088_v0 = vld [vmem:[%s3073_s13] sm:$0xff]  ;;  %v3091_v1 = vld [vmem:[%s3073_s13 + $0x8] sm:$0xff]  ;;  %s2363_s30 = smul.u32 384, %s3069_s23  ;;  %s1981_s26 = scalar_lea.sflag [#allocation4], %s3069_s23 }
  0x69   : > { %v3094_v2 = vld [vmem:[%s3073_s13 + $0x20] sm:$0xff]  ;;  %v338_v3 = vadd.f32 %v3091_v1, %v3088_v0  ;;  %v3099_v4 = vld [vmem:[%s3073_s13 + $0x28] sm:$0xff]  ;;  %v3102_v5 = vld [vmem:[%s3073_s13 + $0x10] sm:$0xff]  ;;  %s2364_s7 = smul.u32 96, %s2851_s21  ;;  %s2877_s14 = smov [#allocation10]  }
  0x6a   : > { %v3105_v6 = vld [vmem:[%s3073_s13 + $0x18] sm:$0xff]  ;;  %v344_v7 = vadd.f32 %v3099_v4, %v3094_v2  ;;  %v3110_v8 = vld [vmem:[%s3073_s13 + $0x30] sm:$0xff]  ;;  %v3120_v12 = vld [vmem:[%s3073_s13 + $0x40] sm:$0xff]  ;;  %s3582_s6 = scalar_lea.vmem [#allocation10], %s2363_s30  ;;  %s2365_s29 = smul.u32 192, %s2855_s22 }
  0x6b   : > { %v3113_v9 = vld [vmem:[%s3073_s13 + $0x38] sm:$0xff]  ;;  %339 = vadd.xlane.f32.xlu0 %v338_v3  ;;  %v341_v10 = vadd.f32 %v3105_v6, %v3102_v5  ;;  %v3123_v13 = vld [vmem:[%s3073_s13 + $0x48] sm:$0xff]  ;;  %v3126_v14 = vld [vmem:[%s3073_s13 + $0x50] sm:$0xff]  ;;  %s1997_s22 = sshll.u32 %s3582_s6, 4  ;;  %s2767_s9 = sshll.u32 %s2877_s14, 4  ;;  %s3733_s22 = int_to_ptr.vmem [resolvable:$true] %s1997_s22  ;;  %s2768_s9 = int_to_ptr.vmem [resolvable:$false] %s2767_s9 }
  0x6c   : > { %345 = vadd.xlane.f32.xlu1 %v344_v7  ;;  %v347_v11 = vadd.f32 %v3113_v9, %v3110_v8  ;;  %v3129_v15 = vld [vmem:[%s3073_s13 + $0x58] sm:$0xff]  ;;  %v350_v16 = vadd.f32 %v3123_v13, %v3120_v12  ;;  %v3136_v18 = vld [vmem:[%s3073_s13 + $0x60] sm:$0xff]  ;;  %v3139_v19 = vld [vmem:[%s3073_s13 + $0x68] sm:$0xff]  ;;  %s1994_s21 = sadd.s32 %s2365_s29, %s2364_s7  ;;  %s2763_s3 = scalar_lea.vmem %s3733_s22, 6144 }
  0x6d   : > { %v353_v17 = vadd.f32 %v3129_v15, %v3126_v14  ;;  %v3142_v20 = vld [vmem:[%s3073_s13 + $0x70] sm:$0xff]  ;;  %v3145_v21 = vld [vmem:[%s3073_s13 + $0x78] sm:$0xff]  ;;  %v3148_v22 = vld [vmem:[%s3073_s13 + $0x80] sm:$0xff]  ;;  %v356_v24 = vadd.f32 %v3139_v19, %v3136_v18  ;;  %s2279_s15 = sshll.u32 %s1994_s21, 6  ;;  %p2764_p1 = scmp.ne.s32.totalorder %s3733_s22, %s2763_s3 }
  0x6e   : > { %v3151_v23 = vld [vmem:[%s3073_s13 + $0x88] sm:$0xff]  ;;  %v3156_v25 = vld [vmem:[%s3073_s13 + $0x90] sm:$0xff]  ;;  %v3159_v26 = vld [vmem:[%s3073_s13 + $0x98] sm:$0xff]  ;;  %v359_v27 = vadd.f32 %v3145_v21, %v3142_v20  ;;  %s3738_s11 = scalar_lea.hbm %s3798_s5, %s2279_s15  ;;  %s2769_s18 = scalar_lea.vmem %s2768_s9, 12288 }
  0x6f   : > { %342 = vadd.xlane.f32.xlu0 %v341_v10  ;;  %v3164_v28 = vld [vmem:[%s3073_s13 + $0xa0] sm:$0xff]  ;;  %v3167_v29 = vld [vmem:[%s3073_s13 + $0xa8] sm:$0xff]  ;;  %v362_v30 = vadd.f32 %v3151_v23, %v3148_v22  ;;  %v3172_v31 = vld [vmem:[%s3073_s13 + $0xb0] sm:$0xff]  ;;  %v365_v33 = vadd.f32 %v3159_v26, %v3156_v25  ;;  %p2765_p6 = pnand %p2764_p1, %p3032_p13  ;;  %p2770_p4 = scmp.lt.s32.totalorder %s3733_s22, %s2768_s9 }
  0x70   : > { %348 = vadd.xlane.f32.xlu1 %v347_v11  ;;  %v3175_v32 = vld [vmem:[%s3073_s13 + $0xb8] sm:$0xff]  ;;  %v3180_v34 = vld [vmem:[%s3073_s13 + $0xc0] sm:$0xff]  ;;  %v3183_v35 = vld [vmem:[%s3073_s13 + $0xc8] sm:$0xff]  ;;  %v368_v36 = vadd.f32 %v3167_v29, %v3164_v28  ;;  %p2771_p2 = scmp.lt.s32.totalorder %s2769_s18, %s2763_s3 }
  0x71   : > { %v3188_v37 = vld [vmem:[%s3073_s13 + $0xd0] sm:$0xff]  ;;  %v3191_v38 = vld [vmem:[%s3073_s13 + $0xd8] sm:$0xff]  ;;  %v371_v39 = vadd.f32 %v3175_v32, %v3172_v31  ;;  %v3196_v40 = vld [vmem:[%s3073_s13 + $0xe0] sm:$0xff]  ;;  %v374_v42 = vadd.f32 %v3183_v35, %v3180_v34  ;;  %p2766_p3 = pneg %p2765_p6 }
  0x72   : > { %v3199_v41 = vld [vmem:[%s3073_s13 + $0xe8] sm:$0xff]  ;;  %v3204_v43 = vld [vmem:[%s3073_s13 + $0xf0] sm:$0xff]  ;;  %v3207_v44 = vld [vmem:[%s3073_s13 + $0xf8] sm:$0xff]  ;;  %v377_v45 = vadd.f32 %v3191_v38, %v3188_v37  ;;  %p2772_p8 = por %p2771_p2, %p2770_p4 }
  0x73   : > { %351 = vadd.xlane.f32.xlu0 %v350_v16  ;;  %v380_v46 = vadd.f32 %v3199_v41, %v3196_v40  ;;  %v383_v47 = vadd.f32 %v3207_v44, %v3204_v43  ;;  %v2481_v48 = vld [vmem:[#allocation8 + $0x154] ss:$24 sps:$4 sm:$0xff]   ;;  %v2485_v50 = vld [vmem:[#allocation8 + $0x150] ss:$24 sps:$4 sm:$0xff]   ;;  %v2487_v52 = vld [vmem:[#allocation8 + $0x124] ss:$24 sps:$4 sm:$0xff]  }
  0x74   : > { %354 = vadd.xlane.f32.xlu1 %v353_v17  ;;  %v2483_v49 = vld [vmem:[#allocation8 + $0x15c] ss:$24 sps:$4 sm:$0xff]   ;;  %v2486_v51 = vld [vmem:[#allocation8 + $0x158] ss:$24 sps:$4 sm:$0xff]   ;;  %v2489_v53 = vld [vmem:[#allocation8 + $0x12c] ss:$24 sps:$4 sm:$0xff]   ;;  %1305 = vmatprep.subr.bf16.mxu0 %v2481_v48  ;;  %p2773_p11 = pnand %p2772_p8, %p2766_p3 }
  0x75   : > { %1418 = vmatprep.subr.bf16.mxu1 %v2483_v49  ;;  %1306 = vmatpush1.bf16.msra.mxu0 %v2485_v50  ;;  %v2491_v54 = vld [vmem:[#allocation8 + $0x120] ss:$24 sps:$4 sm:$0xff]   ;;  %v2493_v56 = vld [vmem:[#allocation8 + $0xf4] ss:$24 sps:$4 sm:$0xff]   ;;  %v2497_v58 = vld [vmem:[#allocation8 + $0xf0] ss:$24 sps:$4 sm:$0xff]  }
  0x76   : > { %1419 = vmatpush1.bf16.msra.mxu1 %v2486_v51  ;;  %v2492_v55 = vld [vmem:[#allocation8 + $0x128] ss:$24 sps:$4 sm:$0xff]   ;;  %1307 = vmatprep.subr.bf16.mxu0 %v2487_v52  ;;  %v2495_v57 = vld [vmem:[#allocation8 + $0xfc] ss:$24 sps:$4 sm:$0xff]   ;;  %v2498_v59 = vld [vmem:[#allocation8 + $0xf8] ss:$24 sps:$4 sm:$0xff]  }
  0x77   : > { %357 = vadd.xlane.f32.xlu0 %v356_v24  ;;  %1420 = vmatprep.subr.bf16.mxu1 %v2489_v53  ;;  %v2499_v60 = vld [vmem:[#allocation8 + $0xc4] ss:$24 sps:$4 sm:$0xff]   ;;  %v2503_v62 = vld [vmem:[#allocation8 + $0xc0] ss:$24 sps:$4 sm:$0xff]   ;;  %v2505_v3 = vld [vmem:[#allocation8 + $0x94] ss:$24 sps:$4 sm:$0xff]  }
  0x78   : > { %360 = vadd.xlane.f32.xlu1 %v359_v27  ;;  %v2501_v61 = vld [vmem:[#allocation8 + $0xcc] ss:$24 sps:$4 sm:$0xff]   ;;  %v2504_v63 = vld [vmem:[#allocation8 + $0xc8] ss:$24 sps:$4 sm:$0xff]   ;;  %v2507_v7 = vld [vmem:[#allocation8 + $0x9c] ss:$24 sps:$4 sm:$0xff]  }
  0x79   : > { %1308 = vmatpush1.bf16.msra.mxu0 %v2491_v54  ;;  %v2509_v10 = vld [vmem:[#allocation8 + $0x90] ss:$24 sps:$4 sm:$0xff]   ;;  %v2511_v16 = vld [vmem:[#allocation8 + $0x64] ss:$24 sps:$4 sm:$0xff]   ;;  %v2515_v24 = vld [vmem:[#allocation8 + $0x60] ss:$24 sps:$4 sm:$0xff]  }
  0x7a   : > { %1421 = vmatpush1.bf16.msra.mxu1 %v2492_v55  ;;  %1309 = vmatprep.subr.bf16.mxu0 %v2493_v56  ;;  %v2510_v11 = vld [vmem:[#allocation8 + $0x98] ss:$24 sps:$4 sm:$0xff]   ;;  %v2513_v17 = vld [vmem:[#allocation8 + $0x6c] ss:$24 sps:$4 sm:$0xff]   ;;  %v2516_v27 = vld [vmem:[#allocation8 + $0x68] ss:$24 sps:$4 sm:$0xff]  }
  0x7b   : > { %363 = vadd.xlane.f32.xlu0 %v362_v30  ;;  %1422 = vmatprep.subr.bf16.mxu1 %v2495_v57  ;;  %v2517_v30 = vld [vmem:[#allocation8 + $0x34] ss:$24 sps:$4 sm:$0xff]   ;;  %v2533_v50 = vld [vmem:[#allocation8 + $0x2d0] ss:$24 sps:$4 sm:$0xff]  }
  0x7c   : > { %366 = vadd.xlane.f32.xlu1 %v365_v33  ;;  %v2519_v33 = vld [vmem:[#allocation8 + $0x3c] ss:$24 sps:$4 sm:$0xff]   ;;  %v2534_v51 = vld [vmem:[#allocation8 + $0x2d8] ss:$24 sps:$4 sm:$0xff]  }
  0x7d   : > { %1310 = vmatpush1.bf16.msra.mxu0 %v2497_v58  ;;  %v2529_v48 = vld [vmem:[#allocation8 + $0x2d4] ss:$24 sps:$4 sm:$0xff]  }
  0x7e   : > { %1423 = vmatpush1.bf16.msra.mxu1 %v2498_v59  ;;  %1311 = vmatprep.subr.bf16.mxu0 %v2499_v60  ;;  %v2531_v49 = vld [vmem:[#allocation8 + $0x2dc] ss:$24 sps:$4 sm:$0xff]  }
  0x7f   : > { %369 = vadd.xlane.f32.xlu0 %v368_v36  ;;  %1424 = vmatprep.subr.bf16.mxu1 %v2501_v61  ;;  %v2521_v36 = vld [vmem:[#allocation8 + $0x30] ss:$24 sps:$4 sm:$0xff]  }
  0x80   : > { %372 = vadd.xlane.f32.xlu1 %v371_v39  ;;  %v2522_v39 = vld [vmem:[#allocation8 + $0x38] ss:$24 sps:$4 sm:$0xff]  }
  0x81   : > { %1312 = vmatpush1.bf16.msra.mxu0 %v2503_v62 }
  0x82   : > { %1425 = vmatpush1.bf16.msra.mxu1 %v2504_v63  ;;  %1313 = vmatprep.subr.bf16.mxu0 %v2505_v3 }
  0x83   : > { %375 = vadd.xlane.f32.xlu0 %v374_v42  ;;  %1426 = vmatprep.subr.bf16.mxu1 %v2507_v7  ;;  %v2523_v42 = vld [vmem:[#allocation8 + $0x4] ss:$24 sps:$4 sm:$0xff]  }
  0x84   : > { %378 = vadd.xlane.f32.xlu1 %v377_v45  ;;  %v2525_v45 = vld [vmem:[#allocation8 + $0xc] ss:$24 sps:$4 sm:$0xff]  }
  0x85   : > { %1314 = vmatpush1.bf16.msra.mxu0 %v2509_v10 }
  0x86   : > { %1427 = vmatpush1.bf16.msra.mxu1 %v2510_v11  ;;  %1315 = vmatprep.subr.bf16.mxu0 %v2511_v16 }
  0x87   : > { %381 = vadd.xlane.f32.xlu0 %v380_v46  ;;  %1428 = vmatprep.subr.bf16.mxu1 %v2513_v17  ;;  %v2527_v46 = vld [vmem:[#allocation8] ss:$24 sps:$4 sm:$0xff]  }
  0x88   : > { %384 = vadd.xlane.f32.xlu1 %v383_v47  ;;  %v2528_v47 = vld [vmem:[#allocation8 + $0x8] ss:$24 sps:$4 sm:$0xff]  }
  0x89   : > { %1316 = vmatpush1.bf16.msra.mxu0 %v2515_v24 }
  0x8a   : > { %1429 = vmatpush1.bf16.msra.mxu1 %v2516_v27  ;;  %1317 = vmatprep.subr.bf16.mxu0 %v2517_v30 }
  0x8b   : > { %1430 = vmatprep.subr.bf16.mxu1 %v2519_v33 }
  0x8d   : > { %1318 = vmatpush1.bf16.msra.mxu0 %v2521_v36 }
  0x8e   : > { %1431 = vmatpush1.bf16.msra.mxu1 %v2522_v39  ;;  %1319 = vmatprep.subr.bf16.mxu0 %v2523_v42 }
  0x8f   : > { %1432 = vmatprep.subr.bf16.mxu1 %v2525_v45 }
  0x91   : > { %1320 = vmatpush1.bf16.msra.mxu0 %v2527_v46 }
  0x92   : > { %1433 = vmatpush1.bf16.msra.mxu1 %v2528_v47  ;;  %1321 = vmatprep.subr.bf16.mxu0 %v2529_v48 }
  0x93   : > { %1434 = vmatprep.subr.bf16.mxu1 %v2531_v49 }
  0x95   : > { %1322 = vmatpush2.bf16.msra.mxu0 %v2533_v50 }
  0x96   : > { %1435 = vmatpush2.bf16.msra.mxu1 %v2534_v51 }
  0xf4   : > { %v340_v52 = vpop.xlane.xlu0 %339 }
  0xf5   : > { %v387_v53 = vmul.f32 0.00390625, %v340_v52  ;;  %v346_v54 = vpop.xlane.xlu1 %345 }
  0xf6   : > { %v389_v55 = vmul.f32 0.00390625, %v346_v54 }
  0xf7   : > { %v3216_v56 = vsub.f32 %v3088_v0, %v387_v53  ;;  %v3219_v57 = vsub.f32 %v3091_v1, %v387_v53 }
  0xf8   : > { %v3222_v58 = vsub.f32 %v3094_v2, %v389_v55  ;;  %v3225_v59 = vsub.f32 %v3099_v4, %v389_v55  ;;  %v343_v60 = vpop.xlane.xlu0 %342 }
  0xf9   : > { %v388_v61 = vmul.f32 0.00390625, %v343_v60  ;;  %v349_v62 = vpop.xlane.xlu1 %348  ;;  %v435_v63 = vmul.f32 %v3216_v56, %v3216_v56  ;;  %v436_v3 = vmul.f32 %v3219_v57, %v3219_v57 }
  0xfa   : > { %v390_v0 = vmul.f32 0.00390625, %v349_v62  ;;  %v439_v1 = vmul.f32 %v3222_v58, %v3222_v58  ;;  %v440_v2 = vmul.f32 %v3225_v59, %v3225_v59 }
  0xfb   : > { %v3236_v7 = vsub.f32 %v3102_v5, %v388_v61  ;;  %v3239_v4 = vsub.f32 %v3105_v6, %v388_v61  ;;  %v467_v10 = vadd.f32 %v436_v3, %v435_v63 }
  0xfc   : > { %v3242_v11 = vsub.f32 %v3110_v8, %v390_v0  ;;  %v3245_v16 = vsub.f32 %v3113_v9, %v390_v0  ;;  %v352_v17 = vpop.xlane.xlu0 %351  ;;  %v473_v30 = vadd.f32 %v440_v2, %v439_v1 }
  0xfd   : > { %v391_v24 = vmul.f32 0.00390625, %v352_v17  ;;  %468 = vadd.xlane.f32.xlu0 %v467_v10  ;;  %v355_v27 = vpop.xlane.xlu1 %354  ;;  %v437_v33 = vmul.f32 %v3236_v7, %v3236_v7  ;;  %v438_v5 = vmul.f32 %v3239_v4, %v3239_v4 }
  0xfe   : > { %v392_v6 = vmul.f32 0.00390625, %v355_v27  ;;  %v441_v36 = vmul.f32 %v3242_v11, %v3242_v11  ;;  %v442_v8 = vmul.f32 %v3245_v16, %v3245_v16 }
  0xff   : > { %v3256_v9 = vsub.f32 %v3120_v12, %v391_v24  ;;  %v3259_v39 = vsub.f32 %v3123_v13, %v391_v24  ;;  %v470_v42 = vadd.f32 %v438_v5, %v437_v33  ;;  %v2537_v33 = vld [vmem:[#allocation8 + $0x2ac] ss:$24 sps:$4 sm:$0xff]  }
 0x100   : > { %v3262_v45 = vsub.f32 %v3126_v14, %v392_v6  ;;  %v3265_v46 = vsub.f32 %v3129_v15, %v392_v6  ;;  %v358_v47 = vpop.xlane.xlu0 %357  ;;  %v476_v50 = vadd.f32 %v442_v8, %v441_v36  ;;  %v2539_v8 = vld [vmem:[#allocation8 + $0x2a0] ss:$24 sps:$4 sm:$0xff]   ;;  %1436 = vmatprep.subr.bf16.mxu1 %v2537_v33 }
 0x101   : > { %v393_v48 = vmul.f32 0.00390625, %v358_v47  ;;  %474 = vadd.xlane.f32.xlu0 %v473_v30  ;;  %471 = vadd.xlane.f32.xlu1 %v470_v42  ;;  %v361_v49 = vpop.xlane.xlu1 %360  ;;  %v443_v12 = vmul.f32 %v3256_v9, %v3256_v9  ;;  %v444_v13 = vmul.f32 %v3259_v39, %v3259_v39  ;;  %v2535_v30 = vld [vmem:[#allocation8 + $0x2a4] ss:$24 sps:$4 sm:$0xff]  }
 0x102   : > { %v394_v51 = vmul.f32 0.00390625, %v361_v49  ;;  %v445_v14 = vmul.f32 %v3262_v45, %v3262_v45  ;;  %v446_v15 = vmul.f32 %v3265_v46, %v3265_v46  ;;  %1323 = vmatprep.subr.bf16.mxu0 %v2535_v30 }
 0x103   : > { %v3276_v52 = vsub.f32 %v3136_v18, %v393_v48  ;;  %v3279_v53 = vsub.f32 %v3139_v19, %v393_v48  ;;  %v479_v54 = vadd.f32 %v444_v13, %v443_v12  ;;  %1324 = vmatpush2.bf16.msra.mxu0 %v2539_v8  ;;  %v2552_v8 = vld [vmem:[#allocation8 + $0x248] ss:$24 sps:$4 sm:$0xff]  }
 0x104   : > { %v3282_v55 = vsub.f32 %v3142_v20, %v394_v51  ;;  %v3285_v60 = vsub.f32 %v3145_v21, %v394_v51  ;;  %v364_v61 = vpop.xlane.xlu0 %363  ;;  %v482_v3 = vadd.f32 %v446_v15, %v445_v14 }
 0x105   : > { %v395_v62 = vmul.f32 0.00390625, %v364_v61  ;;  %477 = vadd.xlane.f32.xlu1 %v476_v50  ;;  %480 = vadd.xlane.f32.xlu0 %v479_v54  ;;  %v367_v63 = vpop.xlane.xlu1 %366  ;;  %v447_v18 = vmul.f32 %v3276_v52, %v3276_v52  ;;  %v448_v19 = vmul.f32 %v3279_v53, %v3279_v53  ;;  %v2541_v61 = vld [vmem:[#allocation8 + $0x274] ss:$24 sps:$4 sm:$0xff]  }
 0x106   : > { %v396_v0 = vmul.f32 0.00390625, %v367_v63  ;;  %v449_v20 = vmul.f32 %v3282_v55, %v3282_v55  ;;  %v450_v21 = vmul.f32 %v3285_v60, %v3285_v60  ;;  %1325 = vmatprep.subr.bf16.mxu0 %v2541_v61 }
 0x107   : > { %v3296_v1 = vsub.f32 %v3148_v22, %v395_v62  ;;  %v3299_v2 = vsub.f32 %v3151_v23, %v395_v62  ;;  %v485_v10 = vadd.f32 %v448_v19, %v447_v18  ;;  %v2543_v62 = vld [vmem:[#allocation8 + $0x27c] ss:$24 sps:$4 sm:$0xff]   ;;  %v2546_v18 = vld [vmem:[#allocation8 + $0x278] ss:$24 sps:$4 sm:$0xff]  }
 0x108   : > { %v3302_v17 = vsub.f32 %v3156_v25, %v396_v0  ;;  %v3305_v24 = vsub.f32 %v3159_v26, %v396_v0  ;;  %v370_v27 = vpop.xlane.xlu0 %369  ;;  %v488_v36 = vadd.f32 %v450_v21, %v449_v20  ;;  %v2540_v25 = vld [vmem:[#allocation8 + $0x2a8] ss:$24 sps:$4 sm:$0xff]  }
 0x109   : > { %v397_v5 = vmul.f32 0.00390625, %v370_v27  ;;  %483 = vadd.xlane.f32.xlu1 %v482_v3  ;;  %486 = vadd.xlane.f32.xlu0 %v485_v10  ;;  %v373_v6 = vpop.xlane.xlu1 %372  ;;  %v451_v22 = vmul.f32 %v3296_v1, %v3296_v1  ;;  %v452_v23 = vmul.f32 %v3299_v2, %v3299_v2  ;;  %v2545_v3 = vld [vmem:[#allocation8 + $0x270] ss:$24 sps:$4 sm:$0xff]  }
 0x10a   : > { %v398_v42 = vmul.f32 0.00390625, %v373_v6  ;;  %v453_v26 = vmul.f32 %v3302_v17, %v3302_v17  ;;  %v454_v47 = vmul.f32 %v3305_v24, %v3305_v24  ;;  %1437 = vmatpush2.bf16.msra.mxu1 %v2540_v25  ;;  %1326 = vmatpush2.bf16.msra.mxu0 %v2545_v3  ;;  %v2547_v6 = vld [vmem:[#allocation8 + $0x244] ss:$24 sps:$4 sm:$0xff]   ;;  %v2565_v3 = vld [vmem:[#allocation8 + $0x1b4] ss:$24 sps:$4 sm:$0xff]  }
 0x10b   : > { %v3316_v48 = vsub.f32 %v3164_v28, %v397_v5  ;;  %v3319_v49 = vsub.f32 %v3167_v29, %v397_v5  ;;  %v491_v50 = vadd.f32 %v452_v23, %v451_v22  ;;  %1438 = vmatprep.subr.bf16.mxu1 %v2543_v62  ;;  %v2551_v23 = vld [vmem:[#allocation8 + $0x240] ss:$24 sps:$4 sm:$0xff]   ;;  %1327 = vmatprep.subr.bf16.mxu0 %v2547_v6  ;;  %v2559_v62 = vld [vmem:[#allocation8 + $0x1e4] ss:$24 sps:$4 sm:$0xff]  }
 0x10c   : > { %v3322_v12 = vsub.f32 %v3172_v31, %v398_v42  ;;  %v3325_v13 = vsub.f32 %v3175_v32, %v398_v42  ;;  %v376_v51 = vpop.xlane.xlu0 %375  ;;  %v494_v54 = vadd.f32 %v454_v47, %v453_v26 }
 0x10d   : > { %v399_v14 = vmul.f32 0.00390625, %v376_v51  ;;  %489 = vadd.xlane.f32.xlu1 %v488_v36  ;;  %492 = vadd.xlane.f32.xlu0 %v491_v50  ;;  %v379_v15 = vpop.xlane.xlu1 %378  ;;  %v455_v28 = vmul.f32 %v3316_v48, %v3316_v48  ;;  %v456_v29 = vmul.f32 %v3319_v49, %v3319_v49 }
 0x10e   : > { %v400_v63 = vmul.f32 0.00390625, %v379_v15  ;;  %v457_v31 = vmul.f32 %v3322_v12, %v3322_v12  ;;  %v458_v32 = vmul.f32 %v3325_v13, %v3325_v13  ;;  %1439 = vmatpush2.bf16.msra.mxu1 %v2546_v18  ;;  %1328 = vmatpush2.bf16.msra.mxu0 %v2551_v23  ;;  %v2555_v15 = vld [vmem:[#allocation8 + $0x21c] ss:$24 sps:$4 sm:$0xff]  }
 0x10f   : > { %v3336_v19 = vsub.f32 %v3180_v34, %v399_v14  ;;  %v3339_v0 = vsub.f32 %v3183_v35, %v399_v14  ;;  %v497_v20 = vadd.f32 %v456_v29, %v455_v28  ;;  %v2553_v14 = vld [vmem:[#allocation8 + $0x214] ss:$24 sps:$4 sm:$0xff]   ;;  %v2558_v28 = vld [vmem:[#allocation8 + $0x218] ss:$24 sps:$4 sm:$0xff]  }
 0x110   : > { %v3342_v21 = vsub.f32 %v3188_v37, %v400_v63  ;;  %v3345_v10 = vsub.f32 %v3191_v38, %v400_v63  ;;  %v382_v27 = vpop.xlane.xlu0 %381  ;;  %v500_v33 = vadd.f32 %v458_v32, %v457_v31  ;;  %v2549_v37 = vld [vmem:[#allocation8 + $0x24c] ss:$24 sps:$4 sm:$0xff]   ;;  %1329 = vmatprep.subr.bf16.mxu0 %v2553_v14  ;;  %v2563_v31 = vld [vmem:[#allocation8 + $0x1e0] ss:$24 sps:$4 sm:$0xff]   ;;  %v2567_v18 = vld [vmem:[#allocation8 + $0x1bc] ss:$24 sps:$4 sm:$0xff]  }
 0x111   : > { %v401_v30 = vmul.f32 0.00390625, %v382_v27  ;;  %495 = vadd.xlane.f32.xlu1 %v494_v54  ;;  %498 = vadd.xlane.f32.xlu0 %v497_v20  ;;  %v385_v34 = vpop.xlane.xlu1 %384  ;;  %v459_v35 = vmul.f32 %v3336_v19, %v3336_v19  ;;  %v460_v5 = vmul.f32 %v3339_v0, %v3339_v0  ;;  %v2557_v54 = vld [vmem:[#allocation8 + $0x210] ss:$24 sps:$4 sm:$0xff]   ;;  %v2561_v63 = vld [vmem:[#allocation8 + $0x1ec] ss:$24 sps:$4 sm:$0xff]  }
 0x112   : > { %v402_v36 = vmul.f32 0.00390625, %v385_v34  ;;  %v461_v38 = vmul.f32 %v3342_v21, %v3342_v21  ;;  %v462_v22 = vmul.f32 %v3345_v10, %v3345_v10  ;;  %1440 = vmatprep.subr.bf16.mxu1 %v2549_v37  ;;  %1330 = vmatpush2.bf16.msra.mxu0 %v2557_v54  ;;  %v2564_v32 = vld [vmem:[#allocation8 + $0x1e8] ss:$24 sps:$4 sm:$0xff]   ;;  %v2570_v27 = vld [vmem:[#allocation8 + $0x1b8] ss:$24 sps:$4 sm:$0xff]  }
 0x113   : > { %v3356_v25 = vsub.f32 %v3196_v40, %v401_v30  ;;  %v3359_v42 = vsub.f32 %v3199_v41, %v401_v30  ;;  %v503_v26 = vadd.f32 %v460_v5, %v459_v35  ;;  %1441 = vmatpush2.bf16.msra.mxu1 %v2552_v8  ;;  %1331 = vmatprep.subr.bf16.mxu0 %v2559_v62  ;;  %v2569_v20 = vld [vmem:[#allocation8 + $0x1b0] ss:$24 sps:$4 sm:$0xff]   ;;  %v2571_v30 = vld [vmem:[#allocation8 + $0x184] ss:$24 sps:$4 sm:$0xff]  }
 0x114   : > { %v3362_v47 = vsub.f32 %v3204_v43, %v402_v36  ;;  %v3365_v50 = vsub.f32 %v3207_v44, %v402_v36  ;;  %v506_v51 = vadd.f32 %v462_v22, %v461_v38  ;;  %1442 = vmatprep.subr.bf16.mxu1 %v2555_v15  ;;  %v2573_v34 = vld [vmem:[#allocation8 + $0x18c] ss:$24 sps:$4 sm:$0xff]   ;;  %v2576_v35 = vld [vmem:[#allocation8 + $0x188] ss:$24 sps:$4 sm:$0xff]  }
 0x115   : > { %501 = vadd.xlane.f32.xlu1 %v500_v33  ;;  %504 = vadd.xlane.f32.xlu0 %v503_v26  ;;  %v463_v40 = vmul.f32 %v3356_v25, %v3356_v25  ;;  %v464_v41 = vmul.f32 %v3359_v42, %v3359_v42  ;;  %v2575_v33 = vld [vmem:[#allocation8 + $0x180] ss:$24 sps:$4 sm:$0xff]   ;;  %v2579_v5 = vld [vmem:[#allocation8 + $0x164] ss:$24 sps:$4 sm:$0xff]   ;;  %v596_v26 = vlaneseq }
 0x116   : > { %v465_v43 = vmul.f32 %v3362_v47, %v3362_v47  ;;  %v466_v44 = vmul.f32 %v3365_v50, %v3365_v50  ;;  %1332 = vmatpush2.bf16.msra.mxu0 %v2563_v31 }
 0x117   : > { %v509_v29 = vadd.f32 %v464_v41, %v463_v40  ;;  %1443 = vmatpush2.bf16.msra.mxu1 %v2558_v28  ;;  %1333 = vmatprep.subr.bf16.mxu0 %v2565_v3 }
 0x118   : > { %v512_v61 = vadd.f32 %v466_v44, %v465_v43  ;;  %1444 = vmatprep.subr.bf16.mxu1 %v2561_v63  ;;  %v3375_v44 = vshrl.u32 %v596_v26, 7 }
 0x119   : > { %507 = vadd.xlane.f32.xlu1 %v506_v51  ;;  %510 = vadd.xlane.f32.xlu0 %v509_v29 }
 0x11a   : > { %1334 = vmatpush2.bf16.msra.mxu0 %v2569_v20  ;;  %v3378_v31 = vsub.s32 1, %v3375_v44 }
 0x11b   : > { %1445 = vmatpush2.bf16.msra.mxu1 %v2564_v32  ;;  %1335 = vmatprep.subr.bf16.mxu0 %v2571_v30  ;;  %v3381_v32 = vsub.s32 0, %v3375_v44 }
 0x11c   : > { %1446 = vmatprep.subr.bf16.mxu1 %v2567_v18  ;;  %v336_v18 = vld [vmem:[#allocation5] sm:$0x3] }
 0x11d   : > { %513 = vadd.xlane.f32.xlu1 %v512_v61 }
 0x11e   : > { %1336 = vmatpush2.bf16.msra.mxu0 %v2575_v33 }
 0x11f   : > { %1447 = vmatpush2.bf16.msra.mxu1 %v2570_v27  ;;  %1531 = vmatprep.subr.bf16.mxu0 %v2579_v5 }
 0x120   : > { %1448 = vmatprep.subr.bf16.mxu1 %v2573_v34 }
 0x123   : > { %1449 = vmatpush2.bf16.msra.mxu1 %v2576_v35  ;;  %v337_v35 = vld [vmem:[#allocation7] sm:$0x3] }
 0x124   : > { %2331 = vmatprep.subr.bf16.mxu1 %v2579_v5  ;;  %v3384_v5 = vrot.slane %v336_v18, %v3378_v31  ;;  %v3392_v26 = vrot.slane %v337_v35, %v3378_v31 }
 0x186   : > { %v469_v6 = vpop.xlane.xlu0 %468 }
 0x187   : > { %v515_v37 = vmul.f32 0.00390625, %v469_v6  ;;  %v3387_v6 = vrot.slane %v336_v18, %v3381_v32 }
 0x189   : > { %v531_v36 = vadd.f32 1e-05, %v515_v37 }
 0x18a   : > { %v472_v38 = vpop.xlane.xlu1 %471  ;;  %v475_v22 = vpop.xlane.xlu0 %474 }
 0x18b   : > { %2625 = vrsqrt.f32 %v531_v36  ;;  %v516_v23 = vmul.f32 0.00390625, %v472_v38  ;;  %v517_v8 = vmul.f32 0.00390625, %v475_v22 }
 0x18d   : > { %v532_v51 = vadd.f32 1e-05, %v516_v23  ;;  %v533_v40 = vadd.f32 1e-05, %v517_v8 }
 0x18e   : > { %v478_v41 = vpop.xlane.xlu1 %477  ;;  %v481_v14 = vpop.xlane.xlu0 %480 }
 0x18f   : > { %2627 = vrsqrt.f32 %v532_v51  ;;  %v518_v15 = vmul.f32 0.00390625, %v478_v41  ;;  %v519_v43 = vmul.f32 0.00390625, %v481_v14  ;;  %v3397_v14 = vrot.slane %v337_v35, %v3381_v32 }
 0x190   : > { %2629 = vrsqrt.f32 %v533_v40 }
 0x191   : > { %v534_v54 = vadd.f32 1e-05, %v518_v15  ;;  %v535_v28 = vadd.f32 1e-05, %v519_v43 }
 0x192   : > { %v484_v29 = vpop.xlane.xlu1 %483  ;;  %v487_v61 = vpop.xlane.xlu0 %486 }
 0x193   : > { %2631 = vrsqrt.f32 %v534_v54  ;;  %v520_v62 = vmul.f32 0.00390625, %v484_v29  ;;  %v521_v63 = vmul.f32 0.00390625, %v487_v61 }
 0x194   : > { %2633 = vrsqrt.f32 %v535_v28 }
 0x195   : > { %v536_v3 = vadd.f32 1e-05, %v520_v62  ;;  %v537_v34 = vadd.f32 1e-05, %v521_v63 }
 0x196   : > { %v490_v20 = vpop.xlane.xlu1 %489  ;;  %v493_v33 = vpop.xlane.xlu0 %492 }
 0x197   : > { %2635 = vrsqrt.f32 %v536_v3  ;;  %v522_v27 = vmul.f32 0.00390625, %v490_v20  ;;  %v523_v23 = vmul.f32 0.00390625, %v493_v33 }
 0x198   : > { %v2626_v30 = vpop.eup %2625 }
 0x199   : > { %v538_v37 = vadd.f32 1e-05, %v522_v27  ;;  %v564_v36 = vmul.f32 %v2626_v30, %v3219_v57  ;;  %v563_v38 = vmul.f32 %v2626_v30, %v3216_v56  ;;  %v539_v28 = vadd.f32 1e-05, %v523_v23 }
 0x19a   : > { %v496_v22 = vpop.xlane.xlu1 %495  ;;  %v499_v20 = vpop.xlane.xlu0 %498 }
 0x19b   : > { %2637 = vrsqrt.f32 %v538_v37  ;;  %v524_v8 = vmul.f32 0.00390625, %v496_v22  ;;  %v607_v40 = vmul.f32 %v3384_v5, %v564_v36  ;;  %v606_v41 = vmul.f32 %v3387_v6, %v563_v38  ;;  %v2577_v36 = vld [vmem:[#allocation8 + $0x160] ss:$24 sps:$4 sm:$0xff]  }
 0x19c   : > { %v2628_v51 = vpop.eup %2627  ;;  %2639 = vrsqrt.f32 %v537_v34  ;;  %v525_v22 = vmul.f32 0.00390625, %v499_v20 }
 0x19d   : > { %v2630_v15 = vpop.eup %2629  ;;  %v540_v57 = vadd.f32 1e-05, %v524_v8  ;;  %v566_v56 = vmul.f32 %v2628_v51, %v3239_v4  ;;  %v565_v43 = vmul.f32 %v2628_v51, %v3236_v7  ;;  %v650_v63 = vadd.f32 %v3392_v26, %v607_v40  ;;  %v2582_v8 = vld [vmem:[#allocation8 + $0x134] ss:$24 sps:$4 sm:$0xff]  }
 0x19e   : > { %v568_v54 = vmul.f32 %v2630_v15, %v3225_v59  ;;  %v502_v29 = vpop.xlane.xlu1 %501  ;;  %v649_v18 = vadd.f32 %v3397_v14, %v606_v41  ;;  %v567_v7 = vmul.f32 %v2630_v15, %v3222_v58 }
 0x19f   : > { %v609_v61 = vmul.f32 %v3384_v5, %v566_v56  ;;  %v608_v3 = vmul.f32 %v3387_v6, %v565_v43  ;;  %2641 = vrsqrt.f32 %v540_v57  ;;  %v526_v30 = vmul.f32 0.00390625, %v502_v29  ;;  %v2580_v43 = vld [vmem:[#allocation8 + $0x130] ss:$24 sps:$4 sm:$0xff]  }
 0x1a0   : > { %v2632_v62 = vpop.eup %2631  ;;  %v611_v33 = vmul.f32 %v3384_v5, %v568_v54  ;;  %2643 = vrsqrt.f32 %v539_v28  ;;  %v610_v51 = vmul.f32 %v3387_v6, %v567_v7  ;;  %v541_v29 = vadd.f32 1e-05, %v525_v22 }
 0x1a1   : > { %v652_v27 = vadd.f32 %v3392_v26, %v609_v61  ;;  %v570_v4 = vmul.f32 %v2632_v62, %v3245_v16  ;;  %v2634_v59 = vpop.eup %2633  ;;  %v651_v34 = vadd.f32 %v3397_v14, %v608_v3  ;;  %v569_v35 = vmul.f32 %v2632_v62, %v3242_v11  ;;  %v2585_v62 = vld [vmem:[#allocation8 + $0x104] ss:$24 sps:$4 sm:$0xff]  }
 0x1a2   : > { %v572_v11 = vmul.f32 %v2634_v59, %v3259_v39  ;;  %v542_v41 = vadd.f32 1e-05, %v526_v30  ;;  %v508_v15 = vpop.xlane.xlu1 %507  ;;  %v654_v57 = vadd.f32 %v3392_v26, %v611_v33  ;;  %v571_v7 = vmul.f32 %v2634_v59, %v3256_v9  ;;  %v2583_v33 = vld [vmem:[#allocation8 + $0x100] ss:$24 sps:$4 sm:$0xff]  }
 0x1a3   : > { %v3412_v37 = vpack.c.bf16 %v652_v27, %v650_v63  ;;  %v3414_v23 = vpack.c.bf16 %v651_v34, %v649_v18  ;;  %v613_v16 = vmul.f32 %v3384_v5, %v570_v4  ;;  %v612_v58 = vmul.f32 %v3387_v6, %v569_v35 }
 0x1a4   : > { %v2636_v38 = vpop.eup %2635  ;;  %v615_v63 = vmul.f32 %v3384_v5, %v572_v11  ;;  %v528_v20 = vmul.f32 0.00390625, %v508_v15  ;;  %v653_v27 = vadd.f32 %v3397_v14, %v610_v51  ;;  %2645 = vrsqrt.f32 %v542_v41  ;;  %v2586_v11 = vld [vmem:[#allocation8 + $0xd0] ss:$24 sps:$4 sm:$0xff]  }
 0x1a5   : > { %1337 = vmatprep.mubr.bf16.mxu0 %v3412_v37  ;;  %1450 = vmatprep.mubr.bf16.mxu1 %v3412_v37  ;;  %v574_v40 = vmul.f32 %v2636_v38, %v3265_v46  ;;  %v656_v56 = vadd.f32 %v3392_v26, %v613_v16  ;;  %v655_v54 = vadd.f32 %v3397_v14, %v612_v58  ;;  %v505_v46 = vpop.xlane.xlu0 %504  ;;  %2647 = vrsqrt.f32 %v541_v29  ;;  %v2588_v16 = vld [vmem:[#allocation8 + $0xd4] ss:$24 sps:$4 sm:$0xff]  }
 0x1a6   : > { %1338 = vmatmul.mubr.bf16.vlgmr.msra.gmra.mxu0 %v3414_v23  ;;  %1451 = vmatmul.mubr.bf16.vlgmr.msra.gmra.mxu1 %v3414_v23  ;;  %v573_v3 = vmul.f32 %v2636_v38, %v3262_v45  ;;  %v527_v34 = vmul.f32 0.00390625, %v505_v46  ;;  %v658_v35 = vadd.f32 %v3392_v26, %v615_v63  ;;  %v544_v22 = vadd.f32 1e-05, %v528_v20  ;;  %v514_v59 = vpop.xlane.xlu1 %513 }
 0x1a7   : > { %1532 = vmatpush1.bf16.msra.mxu0 %v2577_v36  ;;  %2347 = vmatpush1.bf16.msra.mxu1 %v2577_v36  ;;  %v617_v28 = vmul.f32 %v3384_v5, %v574_v40  ;;  %v3429_v61 = vpack.c.bf16 %v656_v56, %v654_v57  ;;  %v3439_v45 = vpack.c.bf16 %v655_v54, %v653_v27 }
 0x1a8   : > { %v2638_v39 = vpop.eup %2637  ;;  %1533 = vmatprep.subr.bf16.mxu0 %v2582_v8  ;;  %2332 = vmatprep.subr.bf16.mxu1 %v2582_v8  ;;  %v616_v36 = vmul.f32 %v3387_v6, %v573_v3  ;;  %v614_v8 = vmul.f32 %v3387_v6, %v571_v7  ;;  %v543_v51 = vadd.f32 1e-05, %v527_v34  ;;  %2649 = vrsqrt.f32 %v544_v22  ;;  %v2592_v7 = vld [vmem:[#allocation8 + $0x70] ss:$24 sps:$4 sm:$0xff]  }
 0x1a9   : > { %v2640_v18 = vpop.eup %2639  ;;  %1347 = vmatprep.mubr.bf16.mxu0 %v3429_v61  ;;  %1460 = vmatprep.mubr.bf16.mxu1 %v3429_v61  ;;  %v660_v4 = vadd.f32 %v3392_v26, %v617_v28  ;;  %v578_v30 = vmul.f32 %v2638_v39, %v3285_v60  ;;  %v577_v57 = vmul.f32 %v2638_v39, %v3282_v55  ;;  %v511_v56 = vpop.xlane.xlu0 %510 }
 0x1aa   : > { %v576_v38 = vmul.f32 %v2640_v18, %v3279_v53  ;;  %v2591_v53 = vld [vmem:[#allocation8 + $0xa4] ss:$24 sps:$4 sm:$0xff]   ;;  %v659_v41 = vadd.f32 %v3397_v14, %v616_v36  ;;  %v657_v54 = vadd.f32 %v3397_v14, %v614_v8  ;;  %v575_v29 = vmul.f32 %v2640_v18, %v3276_v52 }
 0x1ab   : > { %1534 = vmatpush1.bf16.msra.mxu0 %v2580_v43  ;;  %2348 = vmatpush1.bf16.msra.mxu1 %v2580_v43  ;;  %v3446_v60 = vpack.c.bf16 %v660_v4, %v658_v35  ;;  %v621_v58 = vmul.f32 %v3384_v5, %v578_v30  ;;  %v530_v43 = vmul.f32 0.00390625, %v514_v59  ;;  %2651 = vrsqrt.f32 %v543_v51  ;;  %v2594_v4 = vld [vmem:[#allocation8 + $0x74] ss:$24 sps:$4 sm:$0xff]  }
 0x1ac   : > { %1535 = vmatprep.subr.bf16.mxu0 %v2585_v62  ;;  %2333 = vmatprep.subr.bf16.mxu1 %v2585_v62  ;;  %v2642_v9 = vpop.eup %2641  ;;  %v619_v15 = vmul.f32 %v3384_v5, %v576_v38  ;;  %v2589_v62 = vld [vmem:[#allocation8 + $0xa0] ss:$24 sps:$4 sm:$0xff]   ;;  %v529_v55 = vmul.f32 0.00390625, %v511_v56  ;;  %v3460_v39 = vpack.c.bf16 %v659_v41, %v657_v54  ;;  %v620_v20 = vmul.f32 %v3387_v6, %v577_v57 }
 0x1ad   : > { %v2644_v40 = vpop.eup %2643  ;;  %v664_v28 = vadd.f32 %v3392_v26, %v621_v58  ;;  %v582_v46 = vmul.f32 %v2642_v9, %v3305_v24  ;;  %v546_v27 = vadd.f32 1e-05, %v530_v43  ;;  %v618_v24 = vmul.f32 %v3387_v6, %v575_v29  ;;  %v2595_v58 = vld [vmem:[#allocation8 + $0x40] ss:$24 sps:$4 sm:$0xff]  }
 0x1ae   : > { %1348 = vmatmul.mubr.bf16.gmra.mxu0 %v3439_v45  ;;  %1461 = vmatmul.mubr.bf16.gmra.mxu1 %v3439_v45  ;;  %v580_v63 = vmul.f32 %v2644_v40, %v3299_v2  ;;  %v662_v3 = vadd.f32 %v3392_v26, %v619_v15  ;;  %v545_v34 = vadd.f32 1e-05, %v529_v55  ;;  %v663_v35 = vadd.f32 %v3397_v14, %v620_v20  ;;  %v2598_v15 = vld [vmem:[#allocation8 + $0x10] ss:$24 sps:$4 sm:$0xff]  }
 0x1af   : > { %1536 = vmatpush1.bf16.msra.mxu0 %v2583_v33  ;;  %2349 = vmatpush1.bf16.msra.mxu1 %v2583_v33  ;;  %v625_v2 = vmul.f32 %v3384_v5, %v582_v46  ;;  %v2597_v33 = vld [vmem:[#allocation8 + $0x44] ss:$24 sps:$4 sm:$0xff]   ;;  %v581_v36 = vmul.f32 %v2642_v9, %v3302_v17  ;;  %2653 = vrsqrt.f32 %v546_v27  ;;  %v661_v22 = vadd.f32 %v3397_v14, %v618_v24  ;;  %v2606_v27 = vld [vmem:[#allocation8 + $0x2b4] ss:$24 sps:$4 sm:$0xff]   ;;  %v2604_v24 = vld [vmem:[#allocation8 + $0x2b0] ss:$24 sps:$4 sm:$0xff]  }
 0x1b0   : > { %1357 = vmatprep.mubr.bf16.mxu0 %v3446_v60  ;;  %1470 = vmatprep.mubr.bf16.mxu1 %v3446_v60  ;;  %v3466_v52 = vpack.c.bf16 %v664_v28, %v662_v3  ;;  %v623_v30 = vmul.f32 %v3384_v5, %v580_v63  ;;  %v579_v59 = vmul.f32 %v2644_v40, %v3296_v1  ;;  %2655 = vrsqrt.f32 %v545_v34  ;;  %v2601_v63 = vld [vmem:[#allocation8 + $0x2e0] ss:$24 sps:$4 sm:$0xff]  }
 0x1b1   : > { %1537 = vmatprep.subr.bf16.mxu0 %v2588_v16  ;;  %2334 = vmatprep.subr.bf16.mxu1 %v2588_v16  ;;  %v2646_v18 = vpop.eup %2645  ;;  %v668_v16 = vadd.f32 %v3392_v26, %v625_v2  ;;  %v3480_v17 = vpack.c.bf16 %v663_v35, %v661_v22  ;;  %v624_v9 = vmul.f32 %v3387_v6, %v581_v36  ;;  %v2607_v22 = vld [vmem:[#allocation8 + $0x280] ss:$24 sps:$4 sm:$0xff]  }
 0x1b2   : > { %v2648_v38 = vpop.eup %2647  ;;  %v586_v8 = vmul.f32 %v2646_v18, %v3325_v13  ;;  %v666_v51 = vadd.f32 %v3392_v26, %v623_v30  ;;  %v622_v13 = vmul.f32 %v3387_v6, %v579_v59  ;;  %v585_v54 = vmul.f32 %v2646_v18, %v3322_v12  ;;  %v2609_v18 = vld [vmem:[#allocation8 + $0x284] ss:$24 sps:$4 sm:$0xff]  }
 0x1b3   : > { %1538 = vmatpush1.bf16.msra.mxu0 %v2586_v11  ;;  %2350 = vmatpush1.bf16.msra.mxu1 %v2586_v11  ;;  %v584_v11 = vmul.f32 %v2648_v38, %v3319_v49  ;;  %v2603_v49 = vld [vmem:[#allocation8 + $0x2e4] ss:$24 sps:$4 sm:$0xff]   ;;  %v667_v56 = vadd.f32 %v3397_v14, %v624_v9  ;;  %v583_v46 = vmul.f32 %v2648_v38, %v3316_v48  ;;  %v2610_v9 = vld [vmem:[#allocation8 + $0x250] ss:$24 sps:$4 sm:$0xff]  }
 0x1b4   : > { %1539 = vmatprep.subr.bf16.mxu0 %v2591_v53  ;;  %2335 = vmatprep.subr.bf16.mxu1 %v2591_v53  ;;  %v2600_v53 = vld [vmem:[#allocation8 + $0x14] ss:$24 sps:$4 sm:$0xff]   ;;  %v3486_v1 = vpack.c.bf16 %v668_v16, %v666_v51  ;;  %v629_v40 = vmul.f32 %v3384_v5, %v586_v8  ;;  %v665_v28 = vadd.f32 %v3397_v14, %v622_v13 }
 0x1b5   : > { %v2650_v41 = vpop.eup %2649  ;;  %v627_v43 = vmul.f32 %v3384_v5, %v584_v11  ;;  %v628_v20 = vmul.f32 %v3387_v6, %v585_v54  ;;  %v2615_v11 = vld [vmem:[#allocation8 + $0x224] ss:$24 sps:$4 sm:$0xff]  }
 0x1b6   : > { %1358 = vmatmul.mubr.bf16.gmra.mxu0 %v3460_v39  ;;  %1471 = vmatmul.mubr.bf16.gmra.mxu1 %v3460_v39  ;;  %v672_v29 = vadd.f32 %v3392_v26, %v629_v40  ;;  %v3500_v3 = vpack.c.bf16 %v667_v56, %v665_v28  ;;  %v589_v30 = vmul.f32 %v2650_v41, %v3342_v21  ;;  %v2616_v28 = vld [vmem:[#allocation8 + $0x1f0] ss:$24 sps:$4 sm:$0xff]  }
 0x1b7   : > { %1540 = vmatpush1.bf16.msra.mxu0 %v2589_v62  ;;  %2351 = vmatpush1.bf16.msra.mxu1 %v2589_v62  ;;  %v590_v62 = vmul.f32 %v2650_v41, %v3345_v10  ;;  %v670_v12 = vadd.f32 %v3392_v26, %v627_v43  ;;  %v626_v10 = vmul.f32 %v3387_v6, %v583_v46  ;;  %v2618_v43 = vld [vmem:[#allocation8 + $0x1f4] ss:$24 sps:$4 sm:$0xff]   ;;  %v2619_v46 = vld [vmem:[#allocation8 + $0x1c0] ss:$24 sps:$4 sm:$0xff]  }
 0x1b8   : > { %1367 = vmatprep.mubr.bf16.mxu0 %v3466_v52  ;;  %1480 = vmatprep.mubr.bf16.mxu1 %v3466_v52  ;;  %v2652_v57 = vpop.eup %2651  ;;  %v632_v21 = vmul.f32 %v3387_v6, %v589_v30 }
 0x1b9   : > { %1541 = vmatprep.subr.bf16.mxu0 %v2594_v4  ;;  %2336 = vmatprep.subr.bf16.mxu1 %v2594_v4  ;;  %v588_v55 = vmul.f32 %v2652_v57, %v3339_v0  ;;  %v3506_v48 = vpack.c.bf16 %v672_v29, %v670_v12  ;;  %v633_v0 = vmul.f32 %v3384_v5, %v590_v62 }
 0x1ba   : > { %v587_v36 = vmul.f32 %v2652_v57, %v3336_v19  ;;  %v2613_v57 = vld [vmem:[#allocation8 + $0x220] ss:$24 sps:$4 sm:$0xff]  }
 0x1bb   : > { %1542 = vmatpush1.bf16.msra.mxu0 %v2592_v7  ;;  %2352 = vmatpush1.bf16.msra.mxu1 %v2592_v7  ;;  %v631_v2 = vmul.f32 %v3384_v5, %v588_v55  ;;  %v671_v7 = vadd.f32 %v3397_v14, %v628_v20  ;;  %v676_v35 = vadd.f32 %v3392_v26, %v633_v0 }
 0x1bc   : > { %1543 = vmatprep.subr.bf16.mxu0 %v2597_v33  ;;  %2337 = vmatprep.subr.bf16.mxu1 %v2597_v33  ;;  %v2654_v4 = vpop.eup %2653  ;;  %v669_v33 = vadd.f32 %v3397_v14, %v626_v10 }
 0x1bd   : > { %v2656_v34 = vpop.eup %2655  ;;  %v594_v38 = vmul.f32 %v2654_v4, %v3365_v50  ;;  %v674_v16 = vadd.f32 %v3392_v26, %v631_v2  ;;  %v630_v50 = vmul.f32 %v3387_v6, %v587_v36  ;;  %v593_v41 = vmul.f32 %v2654_v4, %v3362_v47 }
 0x1be   : > { %1368 = vmatmul.mubr.bf16.gmra.mxu0 %v3480_v17  ;;  %1481 = vmatmul.mubr.bf16.gmra.mxu1 %v3480_v17  ;;  %v3520_v59 = vpack.c.bf16 %v671_v7, %v669_v33  ;;  %v592_v8 = vmul.f32 %v2656_v34, %v3359_v42  ;;  %v675_v42 = vadd.f32 %v3397_v14, %v632_v21 }
 0x1bf   : > { %1544 = vmatpush1.bf16.msra.mxu0 %v2595_v58  ;;  %2353 = vmatpush1.bf16.msra.mxu1 %v2595_v58  ;;  %v2612_v58 = vld [vmem:[#allocation8 + $0x254] ss:$24 sps:$4 sm:$0xff]   ;;  %v3526_v19 = vpack.c.bf16 %v676_v35, %v674_v16  ;;  %v637_v51 = vmul.f32 %v3384_v5, %v594_v38  ;;  %v673_v13 = vadd.f32 %v3397_v14, %v630_v50 }
 0x1c0   : > { %1377 = vmatprep.mubr.bf16.mxu0 %v3486_v1  ;;  %1490 = vmatprep.mubr.bf16.mxu1 %v3486_v1 }
 0x1c1   : > { %1545 = vmatprep.subr.bf16.mxu0 %v2600_v53  ;;  %2338 = vmatprep.subr.bf16.mxu1 %v2600_v53  ;;  %v635_v53 = vmul.f32 %v3384_v5, %v592_v8  ;;  %v680_v40 = vadd.f32 %v3392_v26, %v637_v51  ;;  %v636_v5 = vmul.f32 %v3387_v6, %v593_v41 }
 0x1c3   : > { %1546 = vmatpush1.bf16.msra.mxu0 %v2598_v15  ;;  %2354 = vmatpush1.bf16.msra.mxu1 %v2598_v15  ;;  %v591_v15 = vmul.f32 %v2656_v34, %v3356_v25  ;;  %v678_v56 = vadd.f32 %v3392_v26, %v635_v53  ;;  %v2621_v25 = vld [vmem:[#allocation8 + $0x1c4] ss:$24 sps:$4 sm:$0xff]   ;;  %v679_v29 = vadd.f32 %v3397_v14, %v636_v5 }
 0x1c4   : > { %1547 = vmatprep.subr.bf16.mxu0 %v2603_v49  ;;  %2339 = vmatprep.subr.bf16.mxu1 %v2603_v49  ;;  %v693_v49 = vpack.c.bf16 %v675_v42, %v673_v13 }
 0x1c5   : > { %v696_v47 = vpack.c.bf16 %v680_v40, %v678_v56  ;;  %v634_v54 = vmul.f32 %v3387_v6, %v591_v15  ;;  %v2622_v6 = vld [vmem:[#allocation8 + $0x190] ss:$24 sps:$4 sm:$0xff]  }
 0x1c6   : > { %1378 = vmatmul.mubr.bf16.gmra.mxu0 %v3500_v3  ;;  %1491 = vmatmul.mubr.bf16.gmra.mxu1 %v3500_v3 }
 0x1c7   : > { %1548 = vmatpush2.bf16.msra.mxu0 %v2601_v63  ;;  %2355 = vmatpush2.bf16.msra.mxu1 %v2601_v63  ;;  %v677_v26 = vadd.f32 %v3397_v14, %v634_v54  ;;  %v2624_v63 = vld [vmem:[#allocation8 + $0x194] ss:$24 sps:$4 sm:$0xff]   ;;  %v805_v14 = vsub.s32 2, %v3375_v44 }
 0x1c8   : > { %1387 = vmatprep.mubr.bf16.mxu0 %v3506_v48  ;;  %1500 = vmatprep.mubr.bf16.mxu1 %v3506_v48 }
 0x1c9   : > { %1549 = vmatprep.subr.bf16.mxu0 %v2606_v27  ;;  %2340 = vmatprep.subr.bf16.mxu1 %v2606_v27  ;;  %v695_v62 = vpack.c.bf16 %v679_v29, %v677_v26 }
 0x1cb   : > { %1550 = vmatpush2.bf16.msra.mxu0 %v2604_v24  ;;  %2356 = vmatpush2.bf16.msra.mxu1 %v2604_v24 }
 0x1cc   : > { %1551 = vmatprep.subr.bf16.mxu0 %v2609_v18  ;;  %2341 = vmatprep.subr.bf16.mxu1 %v2609_v18 }
 0x1ce   : > { %1388 = vmatmul.mubr.bf16.gmra.mxu0 %v3520_v59  ;;  %1501 = vmatmul.mubr.bf16.gmra.mxu1 %v3520_v59 }
 0x1cf   : > { %1552 = vmatpush2.bf16.msra.mxu0 %v2607_v22  ;;  %2357 = vmatpush2.bf16.msra.mxu1 %v2607_v22 }
 0x1d0   : > { %1397 = vmatprep.mubr.bf16.mxu0 %v3526_v19  ;;  %1510 = vmatprep.mubr.bf16.mxu1 %v3526_v19 }
 0x1d1   : > { %1553 = vmatprep.subr.bf16.mxu0 %v2612_v58  ;;  %2342 = vmatprep.subr.bf16.mxu1 %v2612_v58 }
 0x1d3   : > { %1554 = vmatpush2.bf16.msra.mxu0 %v2610_v9  ;;  %2358 = vmatpush2.bf16.msra.mxu1 %v2610_v9 }
 0x1d4   : > { %1555 = vmatprep.subr.bf16.mxu0 %v2615_v11  ;;  %2343 = vmatprep.subr.bf16.mxu1 %v2615_v11 }
 0x1d6   : > { %1398 = vmatmul.mubr.bf16.gmra.mxu0 %v693_v49  ;;  %1511 = vmatmul.mubr.bf16.gmra.mxu1 %v693_v49 }
 0x1d7   : > { %1556 = vmatpush2.bf16.msra.mxu0 %v2613_v57  ;;  %2359 = vmatpush2.bf16.msra.mxu1 %v2613_v57 }
 0x1d8   : > { %1407 = vmatprep.mubr.bf16.mxu0 %v696_v47  ;;  %1520 = vmatprep.mubr.bf16.mxu1 %v696_v47 }
 0x1d9   : > { %1557 = vmatprep.subr.bf16.mxu0 %v2618_v43  ;;  %2344 = vmatprep.subr.bf16.mxu1 %v2618_v43 }
 0x1db   : > { %1558 = vmatpush2.bf16.msra.mxu0 %v2616_v28  ;;  %2360 = vmatpush2.bf16.msra.mxu1 %v2616_v28 }
 0x1dc   : > { %1559 = vmatprep.subr.bf16.mxu0 %v2621_v25  ;;  %2345 = vmatprep.subr.bf16.mxu1 %v2621_v25 }
 0x1de   : > { %1408 = vmatmul.mubr.bf16.gmra.mxu0 %v695_v62  ;;  %1521 = vmatmul.mubr.bf16.gmra.mxu1 %v695_v62 }
 0x1df   : > { %1560 = vmatpush2.bf16.msra.mxu0 %v2619_v46  ;;  %2361 = vmatpush2.bf16.msra.mxu1 %v2619_v46 }
 0x1e0   : > { %1563 = vmatprep.mubr.bf16.mxu0 %v3412_v37  ;;  %1603 = vmatprep.mubr.bf16.mxu1 %v3486_v1  ;;  %v809_v37 = vsub.s32 3, %v3375_v44 }
 0x1e1   : > { %1561 = vmatprep.subr.bf16.mxu0 %v2624_v63  ;;  %2346 = vmatprep.subr.bf16.mxu1 %v2624_v63 }
 0x1e3   : > { %1562 = vmatpush2.bf16.msra.mxu0 %v2622_v6  ;;  %2362 = vmatpush2.bf16.msra.mxu1 %v2622_v6 }
 0x1e6   : > { %1564 = vmatmul.mubr.bf16.vlgmr.msra.gmra.mxu0 %v3414_v23  ;;  %1604 = vmatmul.mubr.bf16.vlgmr.msra.gmra.mxu1 %v3500_v3  ;;  %v3561_v23 = vld [vmem:[%s3797_s4] sm:$0x3f] }
 0x1e7   : > { %1573 = vmatprep.mubr.bf16.mxu0 %v3429_v61  ;;  %1613 = vmatprep.mubr.bf16.mxu1 %v3506_v48  ;;  %v3565_v61 = vrot.slane %v3561_v23, %v3381_v32 }
 0x1ee   : > { %1574 = vmatmul.mubr.bf16.gmra.mxu0 %v3439_v45  ;;  %1614 = vmatmul.mubr.bf16.gmra.mxu1 %v3520_v59  ;;  %v3568_v45 = vrot.slane %v3561_v23, %v805_v14 }
 0x1ef   : > { %1583 = vmatprep.mubr.bf16.mxu0 %v3446_v60  ;;  %1623 = vmatprep.mubr.bf16.mxu1 %v3526_v19  ;;  %v3572_v60 = vrot.slane %v3561_v23, %v3378_v31 }
 0x1f6   : > { %1584 = vmatmul.mubr.bf16.gmra.mxu0 %v3460_v39  ;;  %1624 = vmatmul.mubr.bf16.gmra.mxu1 %v693_v49  ;;  %v3575_v39 = vrot.slane %v3561_v23, %v809_v37 }
 0x1f7   : > { %1593 = vmatprep.mubr.bf16.mxu0 %v3466_v52  ;;  %1633 = vmatprep.mubr.bf16.mxu1 %v696_v47 }
 0x1fe   : > { %1594 = vmatmul.mubr.bf16.gmra.mxu0 %v3480_v17  ;;  %1634 = vmatmul.mubr.bf16.gmra.mxu1 %v695_v62 }
 0x266   : > { %v1339_v52 = vpop.f32.mrf.mxu0  ;;  %v1452_v17 = vpop.f32.mrf.mxu1 }
 0x267   : > { %v1340_v3 = vadd.f32 %v1339_v52, %v3565_v61  ;;  %v1453_v32 = vadd.f32 %v1452_v17, %v3568_v45 }
 0x268   : > { %v1341_v1 = vpop.f32.mrf.mxu0  ;;  %v1454_v55 = vpop.f32.mrf.mxu1 }
 0x269   : > { %v1342_v12 = vadd.f32 %v1341_v1, %v3572_v60  ;;  %v1455_v20 = vadd.f32 %v1454_v55, %v3575_v39 }
 0x26a   : > { %v1343_v27 = vpop.f32.mrf.mxu0  ;;  %v1456_v4 = vpop.f32.mrf.mxu1 }
 0x26b   : > { %v2283_v31 = vpack.c.bf16 %v1342_v12, %v1340_v3  ;;  %v2284_v48 = vpack.c.bf16 %v1455_v20, %v1453_v32  ;;  %v1344_v24 = vadd.f32 %v1343_v27, %v3565_v61  ;;  %v1457_v2 = vadd.f32 %v1456_v4, %v3568_v45 }
 0x26c   : > { %v1345_v10 = vpop.f32.mrf.mxu0  ;;  %v1458_v0 = vpop.f32.mrf.mxu1 }
 0x26d   : > { %1932 = vst [vmem:[%s3582_s6] sm:$0xff] %v2283_v31  ;;  %1933 = vst [vmem:[%s3582_s6 + $0x8] sm:$0xff] %v2284_v48  ;;  %v1346_v18 = vadd.f32 %v1345_v10, %v3572_v60  ;;  %v1459_v7 = vadd.f32 %v1458_v0, %v3575_v39 }
 0x26e   : > { %v1349_v30 = vpop.f32.mrf.mxu0  ;;  %v1462_v34 = vpop.f32.mrf.mxu1 }
 0x26f   : > { %v2286_v33 = vpack.c.bf16 %v1346_v18, %v1344_v24  ;;  %v2287_v35 = vpack.c.bf16 %v1459_v7, %v1457_v2  ;;  %v1350_v22 = vadd.f32 %v1349_v30, %v3565_v61  ;;  %v1463_v16 = vadd.f32 %v1462_v34, %v3568_v45 }
 0x270   : > { %v1351_v36 = vpop.f32.mrf.mxu0  ;;  %v1464_v38 = vpop.f32.mrf.mxu1 }
 0x271   : > { %1935 = vst [vmem:[%s3582_s6 + $0x18] sm:$0xff] %v2286_v33  ;;  %1936 = vst [vmem:[%s3582_s6 + $0x20] sm:$0xff] %v2287_v35  ;;  %v1352_v59 = vadd.f32 %v1351_v36, %v3572_v60  ;;  %v1465_v21 = vadd.f32 %v1464_v38, %v3575_v39 }
 0x272   : > { %v1353_v8 = vpop.f32.mrf.mxu0  ;;  %v1466_v58 = vpop.f32.mrf.mxu1 }
 0x273   : > { %v2289_v19 = vpack.c.bf16 %v1352_v59, %v1350_v22  ;;  %v2290_v50 = vpack.c.bf16 %v1465_v21, %v1463_v16  ;;  %v1354_v11 = vadd.f32 %v1353_v8, %v3565_v61  ;;  %v1467_v42 = vadd.f32 %v1466_v58, %v3568_v45 }
 0x274   : > { %v1355_v51 = vpop.f32.mrf.mxu0  ;;  %v1468_v9 = vpop.f32.mrf.mxu1 }
 0x275   : > { %1938 = vst [vmem:[%s3582_s6 + $0x30] sm:$0xff] %v2289_v19  ;;  %1939 = vst [vmem:[%s3582_s6 + $0x38] sm:$0xff] %v2290_v50  ;;  %v1356_v53 = vadd.f32 %v1355_v51, %v3572_v60  ;;  %v1469_v41 = vadd.f32 %v1468_v9, %v3575_v39 }
 0x276   : > { %v1359_v13 = vpop.f32.mrf.mxu0  ;;  %v1472_v40 = vpop.f32.mrf.mxu1 }
 0x277   : > { %v2292_v15 = vpack.c.bf16 %v1356_v53, %v1354_v11  ;;  %v2293_v57 = vpack.c.bf16 %v1469_v41, %v1467_v42  ;;  %v1360_v5 = vadd.f32 %v1359_v13, %v3565_v61  ;;  %v1473_v43 = vadd.f32 %v1472_v40, %v3568_v45 }
 0x278   : > { %v1361_v49 = vpop.f32.mrf.mxu0  ;;  %v1474_v56 = vpop.f32.mrf.mxu1 }
 0x279   : > { %1941 = vst [vmem:[%s3582_s6 + $0x48] sm:$0xff] %v2292_v15  ;;  %1942 = vst [vmem:[%s3582_s6 + $0x50] sm:$0xff] %v2293_v57  ;;  %v1362_v47 = vadd.f32 %v1361_v49, %v3572_v60  ;;  %v1475_v54 = vadd.f32 %v1474_v56, %v3575_v39 }
 0x27a   : > { %v1363_v28 = vpop.f32.mrf.mxu0  ;;  %v1476_v25 = vpop.f32.mrf.mxu1 }
 0x27b   : > { %v2295_v29 = vpack.c.bf16 %v1362_v47, %v1360_v5  ;;  %v2296_v26 = vpack.c.bf16 %v1475_v54, %v1473_v43  ;;  %v1364_v63 = vadd.f32 %v1363_v28, %v3565_v61  ;;  %v1477_v6 = vadd.f32 %v1476_v25, %v3568_v45 }
 0x27c   : > { %v1365_v46 = vpop.f32.mrf.mxu0  ;;  %v1478_v62 = vpop.f32.mrf.mxu1 }
 0x27d   : > { %1944 = vst [vmem:[%s3582_s6 + $0x60] sm:$0xff] %v2295_v29  ;;  %1945 = vst [vmem:[%s3582_s6 + $0x68] sm:$0xff] %v2296_v26  ;;  %v1366_v14 = vadd.f32 %v1365_v46, %v3572_v60  ;;  %v1479_v37 = vadd.f32 %v1478_v62, %v3575_v39 }
 0x27e   : > { %v1369_v52 = vpop.f32.mrf.mxu0  ;;  %v1482_v17 = vpop.f32.mrf.mxu1 }
 0x27f   : > { %v2298_v1 = vpack.c.bf16 %v1366_v14, %v1364_v63  ;;  %v2299_v55 = vpack.c.bf16 %v1479_v37, %v1477_v6  ;;  %v1370_v12 = vadd.f32 %v1369_v52, %v3565_v61  ;;  %v1483_v20 = vadd.f32 %v1482_v17, %v3568_v45 }
 0x280   : > { %v1371_v3 = vpop.f32.mrf.mxu0  ;;  %v1484_v32 = vpop.f32.mrf.mxu1 }
 0x281   : > { %1947 = vst [vmem:[%s3582_s6 + $0x78] sm:$0xff] %v2298_v1  ;;  %1948 = vst [vmem:[%s3582_s6 + $0x80] sm:$0xff] %v2299_v55  ;;  %v1372_v27 = vadd.f32 %v1371_v3, %v3572_v60  ;;  %v1485_v4 = vadd.f32 %v1484_v32, %v3575_v39 }
 0x282   : > { %v1373_v31 = vpop.f32.mrf.mxu0  ;;  %v1486_v48 = vpop.f32.mrf.mxu1 }
 0x283   : > { %v2301_v10 = vpack.c.bf16 %v1372_v27, %v1370_v12  ;;  %v2302_v0 = vpack.c.bf16 %v1485_v4, %v1483_v20  ;;  %v1374_v18 = vadd.f32 %v1373_v31, %v3565_v61  ;;  %v1487_v7 = vadd.f32 %v1486_v48, %v3568_v45 }
 0x284   : > { %v1375_v24 = vpop.f32.mrf.mxu0  ;;  %v1488_v2 = vpop.f32.mrf.mxu1 }
 0x285   : > { %1950 = vst [vmem:[%s3582_s6 + $0x90] sm:$0xff] %v2301_v10  ;;  %1951 = vst [vmem:[%s3582_s6 + $0x98] sm:$0xff] %v2302_v0  ;;  %v1376_v30 = vadd.f32 %v1375_v24, %v3572_v60  ;;  %v1489_v34 = vadd.f32 %v1488_v2, %v3575_v39 }
 0x286   : > { %v1379_v33 = vpop.f32.mrf.mxu0  ;;  %v1492_v35 = vpop.f32.mrf.mxu1 }
 0x287   : > { %v2304_v36 = vpack.c.bf16 %v1376_v30, %v1374_v18  ;;  %v2305_v38 = vpack.c.bf16 %v1489_v34, %v1487_v7  ;;  %v1380_v59 = vadd.f32 %v1379_v33, %v3565_v61  ;;  %v1493_v21 = vadd.f32 %v1492_v35, %v3568_v45 }
 0x288   : > { %v1381_v22 = vpop.f32.mrf.mxu0  ;;  %v1494_v16 = vpop.f32.mrf.mxu1 }
 0x289   : > { %1953 = vst [vmem:[%s3582_s6 + $0xa8] sm:$0xff] %v2304_v36  ;;  %1954 = vst [vmem:[%s3582_s6 + $0xb0] sm:$0xff] %v2305_v38  ;;  %v1382_v8 = vadd.f32 %v1381_v22, %v3572_v60  ;;  %v1495_v58 = vadd.f32 %v1494_v16, %v3575_v39 }
 0x28a   : > { %v1383_v19 = vpop.f32.mrf.mxu0  ;;  %v1496_v50 = vpop.f32.mrf.mxu1 }
 0x28b   : > { %v2307_v51 = vpack.c.bf16 %v1382_v8, %v1380_v59  ;;  %v2308_v9 = vpack.c.bf16 %v1495_v58, %v1493_v21  ;;  %v1384_v53 = vadd.f32 %v1383_v19, %v3565_v61  ;;  %v1497_v41 = vadd.f32 %v1496_v50, %v3568_v45 }
 0x28c   : > { %v1385_v11 = vpop.f32.mrf.mxu0  ;;  %v1498_v42 = vpop.f32.mrf.mxu1  ;;  %v813_v8 = vsub.s32 4, %v3375_v44  ;;  %v817_v58 = vsub.s32 5, %v3375_v44 }
 0x28d   : > { %1956 = vst [vmem:[%s3582_s6 + $0xc0] sm:$0xff] %v2307_v51  ;;  %1957 = vst [vmem:[%s3582_s6 + $0xc8] sm:$0xff] %v2308_v9  ;;  %v1386_v13 = vadd.f32 %v1385_v11, %v3572_v60  ;;  %v1499_v40 = vadd.f32 %v1498_v42, %v3575_v39 }
 0x28e   : > { %v1389_v15 = vpop.f32.mrf.mxu0  ;;  %v1502_v57 = vpop.f32.mrf.mxu1  ;;  %v3671_v44 = vrot.slane %v3561_v23, %v813_v8 }
 0x28f   : > { %v2310_v49 = vpack.c.bf16 %v1386_v13, %v1384_v53  ;;  %v2311_v56 = vpack.c.bf16 %v1499_v40, %v1497_v41  ;;  %v1390_v47 = vadd.f32 %v1389_v15, %v3565_v61  ;;  %v1503_v54 = vadd.f32 %v1502_v57, %v3568_v45 }
 0x290   : > { %v1391_v5 = vpop.f32.mrf.mxu0  ;;  %v1504_v43 = vpop.f32.mrf.mxu1  ;;  %v3674_v15 = vrot.slane %v3561_v23, %v817_v58 }
 0x291   : > { %1959 = vst [vmem:[%s3582_s6 + $0xd8] sm:$0xff] %v2310_v49  ;;  %1960 = vst [vmem:[%s3582_s6 + $0xe0] sm:$0xff] %v2311_v56  ;;  %v1392_v28 = vadd.f32 %v1391_v5, %v3572_v60  ;;  %v1505_v25 = vadd.f32 %v1504_v43, %v3575_v39 }
 0x292   : > { %v1393_v29 = vpop.f32.mrf.mxu0  ;;  %v1506_v26 = vpop.f32.mrf.mxu1 }
 0x293   : > { %v2313_v46 = vpack.c.bf16 %v1392_v28, %v1390_v47  ;;  %v2314_v62 = vpack.c.bf16 %v1505_v25, %v1503_v54  ;;  %v1394_v14 = vadd.f32 %v1393_v29, %v3565_v61  ;;  %v1507_v37 = vadd.f32 %v1506_v26, %v3568_v45 }
 0x294   : > { %v1395_v63 = vpop.f32.mrf.mxu0  ;;  %v1508_v6 = vpop.f32.mrf.mxu1 }
 0x295   : > { %1962 = vst [vmem:[%s3582_s6 + $0xf0] sm:$0xff] %v2313_v46  ;;  %1963 = vst [vmem:[%s3582_s6 + $0xf8] sm:$0xff] %v2314_v62  ;;  %v1396_v52 = vadd.f32 %v1395_v63, %v3572_v60  ;;  %v1509_v17 = vadd.f32 %v1508_v6, %v3575_v39 }
 0x296   : > { %v1399_v1 = vpop.f32.mrf.mxu0  ;;  %v1512_v55 = vpop.f32.mrf.mxu1 }
 0x297   : > { %v2316_v3 = vpack.c.bf16 %v1396_v52, %v1394_v14  ;;  %v2317_v32 = vpack.c.bf16 %v1509_v17, %v1507_v37  ;;  %v1400_v27 = vadd.f32 %v1399_v1, %v3565_v61  ;;  %v1513_v4 = vadd.f32 %v1512_v55, %v3568_v45 }
 0x298   : > { %v1401_v12 = vpop.f32.mrf.mxu0  ;;  %v1514_v20 = vpop.f32.mrf.mxu1 }
 0x299   : > { %1965 = vst [vmem:[%s3582_s6 + $0x108] sm:$0xff] %v2316_v3  ;;  %1966 = vst [vmem:[%s3582_s6 + $0x110] sm:$0xff] %v2317_v32  ;;  %v1402_v31 = vadd.f32 %v1401_v12, %v3572_v60  ;;  %v1515_v48 = vadd.f32 %v1514_v20, %v3575_v39 }
 0x29a   : > { %v1403_v10 = vpop.f32.mrf.mxu0  ;;  %v1516_v0 = vpop.f32.mrf.mxu1 }
 0x29b   : > { %v2319_v24 = vpack.c.bf16 %v1402_v31, %v1400_v27  ;;  %v2320_v2 = vpack.c.bf16 %v1515_v48, %v1513_v4  ;;  %v1404_v30 = vadd.f32 %v1403_v10, %v3565_v61  ;;  %v1517_v34 = vadd.f32 %v1516_v0, %v3568_v45 }
 0x29c   : > { %v1405_v18 = vpop.f32.mrf.mxu0  ;;  %v1518_v7 = vpop.f32.mrf.mxu1 }
 0x29d   : > { %1968 = vst [vmem:[%s3582_s6 + $0x120] sm:$0xff] %v2319_v24  ;;  %1969 = vst [vmem:[%s3582_s6 + $0x128] sm:$0xff] %v2320_v2  ;;  %v1406_v33 = vadd.f32 %v1405_v18, %v3572_v60  ;;  %v1519_v35 = vadd.f32 %v1518_v7, %v3575_v39 }
 0x29e   : > { %v1409_v36 = vpop.f32.mrf.mxu0  ;;  %v1522_v38 = vpop.f32.mrf.mxu1 }
 0x29f   : > { %v2322_v22 = vpack.c.bf16 %v1406_v33, %v1404_v30  ;;  %v2323_v16 = vpack.c.bf16 %v1519_v35, %v1517_v34  ;;  %v1410_v19 = vadd.f32 %v1409_v36, %v3565_v61  ;;  %v1523_v50 = vadd.f32 %v1522_v38, %v3568_v45 }
 0x2a0   : > { %v1411_v59 = vpop.f32.mrf.mxu0  ;;  %v1524_v21 = vpop.f32.mrf.mxu1 }
 0x2a1   : > { %1971 = vst [vmem:[%s3582_s6 + $0x138] sm:$0xff] %v2322_v22  ;;  %1972 = vst [vmem:[%s3582_s6 + $0x140] sm:$0xff] %v2323_v16  ;;  %v1412_v51 = vadd.f32 %v1411_v59, %v3572_v60  ;;  %v1525_v9 = vadd.f32 %v1524_v21, %v3575_v39 }
 0x2a2   : > { %v1413_v11 = vpop.f32.mrf.mxu0  ;;  %v1526_v42 = vpop.f32.mrf.mxu1 }
 0x2a3   : > { %v2325_v53 = vpack.c.bf16 %v1412_v51, %v1410_v19  ;;  %v2326_v41 = vpack.c.bf16 %v1525_v9, %v1523_v50  ;;  %v1414_v57 = vadd.f32 %v1413_v11, %v3565_v61  ;;  %v1527_v49 = vadd.f32 %v1526_v42, %v3568_v45 }
 0x2a4   : > { %v1415_v13 = vpop.f32.mrf.mxu0  ;;  %v1528_v40 = vpop.f32.mrf.mxu1 }
 0x2a5   : > { %1974 = vst [vmem:[%s3582_s6 + $0x150] sm:$0xff] %v2325_v53  ;;  %1975 = vst [vmem:[%s3582_s6 + $0x158] sm:$0xff] %v2326_v41  ;;  %v1416_v56 = vadd.f32 %v1415_v13, %v3572_v60  ;;  %v1529_v5 = vadd.f32 %v1528_v40, %v3575_v39 }
 0x2a6   : > { %v1565_v43 = vpop.f32.mrf.mxu0  ;;  %v1605_v47 = vpop.f32.mrf.mxu1 }
 0x2a7   : > { %v2328_v54 = vpack.c.bf16 %v1416_v56, %v1414_v57  ;;  %v2329_v28 = vpack.c.bf16 %v1529_v5, %v1527_v49  ;;  %v1566_v23 = vadd.f32 %v1565_v43, %v3671_v44  ;;  %v1606_v61 = vadd.f32 %v1605_v47, %v3671_v44 }
 0x2a8   : > { %v1567_v25 = vpop.f32.mrf.mxu0  ;;  %v1607_v29 = vpop.f32.mrf.mxu1 }
 0x2a9   : > { %1977 = vst [vmem:[%s3582_s6 + $0x168] sm:$0xff] %v2328_v54  ;;  %1978 = vst [vmem:[%s3582_s6 + $0x170] sm:$0xff] %v2329_v28  ;;  %v1568_v45 = vadd.f32 %v1567_v25, %v3674_v15  ;;  %v1608_v60 = vadd.f32 %v1607_v29, %v3674_v15 }
 0x2aa   : > { %v1569_v26 = vpop.f32.mrf.mxu0  ;;  %v1609_v39 = vpop.f32.mrf.mxu1 }
 0x2ab   : > { %v2285_v46 = vpack.c.bf16 %v1568_v45, %v1566_v23  ;;  %v2309_v62 = vpack.c.bf16 %v1608_v60, %v1606_v61  ;;  %v1570_v14 = vadd.f32 %v1569_v26, %v3671_v44  ;;  %v1610_v37 = vadd.f32 %v1609_v39, %v3671_v44 }
 0x2ac   : > { %v1571_v63 = vpop.f32.mrf.mxu0  ;;  %v1611_v6 = vpop.f32.mrf.mxu1 }
 0x2ad   : > { %1934 = vst [vmem:[%s3582_s6 + $0x10] sm:$0xff] %v2285_v46  ;;  %1958 = vst [vmem:[%s3582_s6 + $0xd0] sm:$0xff] %v2309_v62  ;;  %v1572_v52 = vadd.f32 %v1571_v63, %v3674_v15  ;;  %v1612_v17 = vadd.f32 %v1611_v6, %v3674_v15 }
 0x2ae   : > { %v1575_v1 = vpop.f32.mrf.mxu0  ;;  %v1615_v55 = vpop.f32.mrf.mxu1 }
 0x2af   : > { %v2288_v3 = vpack.c.bf16 %v1572_v52, %v1570_v14  ;;  %v2312_v32 = vpack.c.bf16 %v1612_v17, %v1610_v37  ;;  %v1576_v27 = vadd.f32 %v1575_v1, %v3671_v44  ;;  %v1616_v4 = vadd.f32 %v1615_v55, %v3671_v44 }
 0x2b0   : > { %v1577_v12 = vpop.f32.mrf.mxu0  ;;  %v1617_v20 = vpop.f32.mrf.mxu1 }
 0x2b1   : > { %1937 = vst [vmem:[%s3582_s6 + $0x28] sm:$0xff] %v2288_v3  ;;  %1961 = vst [vmem:[%s3582_s6 + $0xe8] sm:$0xff] %v2312_v32  ;;  %v1578_v31 = vadd.f32 %v1577_v12, %v3674_v15  ;;  %v1618_v48 = vadd.f32 %v1617_v20, %v3674_v15 }
 0x2b2   : > { %v1579_v10 = vpop.f32.mrf.mxu0  ;;  %v1619_v0 = vpop.f32.mrf.mxu1 }
 0x2b3   : > { %v2291_v24 = vpack.c.bf16 %v1578_v31, %v1576_v27  ;;  %v2315_v2 = vpack.c.bf16 %v1618_v48, %v1616_v4  ;;  %v1580_v30 = vadd.f32 %v1579_v10, %v3671_v44  ;;  %v1620_v34 = vadd.f32 %v1619_v0, %v3671_v44 }
 0x2b4   : > { %v1581_v18 = vpop.f32.mrf.mxu0  ;;  %v1621_v7 = vpop.f32.mrf.mxu1 }
 0x2b5   : > { %1940 = vst [vmem:[%s3582_s6 + $0x40] sm:$0xff] %v2291_v24  ;;  %1964 = vst [vmem:[%s3582_s6 + $0x100] sm:$0xff] %v2315_v2  ;;  %v1582_v33 = vadd.f32 %v1581_v18, %v3674_v15  ;;  %v1622_v35 = vadd.f32 %v1621_v7, %v3674_v15 }
 0x2b6   : > { %v1585_v36 = vpop.f32.mrf.mxu0  ;;  %v1625_v38 = vpop.f32.mrf.mxu1 }
 0x2b7   : > { %v2294_v22 = vpack.c.bf16 %v1582_v33, %v1580_v30  ;;  %v2318_v16 = vpack.c.bf16 %v1622_v35, %v1620_v34  ;;  %v1586_v8 = vadd.f32 %v1585_v36, %v3671_v44  ;;  %v1626_v58 = vadd.f32 %v1625_v38, %v3671_v44 }
 0x2b8   : > { %v1587_v59 = vpop.f32.mrf.mxu0  ;;  %v1627_v21 = vpop.f32.mrf.mxu1 }
 0x2b9   : > { %1943 = vst [vmem:[%s3582_s6 + $0x58] sm:$0xff] %v2294_v22  ;;  %1967 = vst [vmem:[%s3582_s6 + $0x118] sm:$0xff] %v2318_v16  ;;  %v1588_v19 = vadd.f32 %v1587_v59, %v3674_v15  ;;  %v1628_v50 = vadd.f32 %v1627_v21, %v3674_v15 }
 0x2ba   : > { %v1589_v51 = vpop.f32.mrf.mxu0  ;;  %v1629_v9 = vpop.f32.mrf.mxu1 }
 0x2bb   : > { %v2297_v11 = vpack.c.bf16 %v1588_v19, %v1586_v8  ;;  %v2321_v42 = vpack.c.bf16 %v1628_v50, %v1626_v58  ;;  %v1590_v13 = vadd.f32 %v1589_v51, %v3671_v44  ;;  %v1630_v40 = vadd.f32 %v1629_v9, %v3671_v44 }
 0x2bc   : > { %v1591_v53 = vpop.f32.mrf.mxu0  ;;  %v1631_v41 = vpop.f32.mrf.mxu1 }
 0x2bd   : > { %1946 = vst [vmem:[%s3582_s6 + $0x70] sm:$0xff] %v2297_v11  ;;  %1970 = vst [vmem:[%s3582_s6 + $0x130] sm:$0xff] %v2321_v42  ;;  %v1592_v57 = vadd.f32 %v1591_v53, %v3674_v15  ;;  %v1632_v49 = vadd.f32 %v1631_v41, %v3674_v15 }
 0x2be   : > { %v1595_v56 = vpop.f32.mrf.mxu0  ;;  %v1635_v5 = vpop.f32.mrf.mxu1 }
 0x2bf   : > { %v2300_v43 = vpack.c.bf16 %v1592_v57, %v1590_v13  ;;  %v2324_v47 = vpack.c.bf16 %v1632_v49, %v1630_v40  ;;  %v1596_v25 = vadd.f32 %v1595_v56, %v3671_v44  ;;  %v1636_v29 = vadd.f32 %v1635_v5, %v3671_v44 }
 0x2c0   : > { %v1597_v54 = vpop.f32.mrf.mxu0  ;;  %v1637_v28 = vpop.f32.mrf.mxu1 }
 0x2c1   : > { %1949 = vst [vmem:[%s3582_s6 + $0x88] sm:$0xff] %v2300_v43  ;;  %1973 = vst [vmem:[%s3582_s6 + $0x148] sm:$0xff] %v2324_v47  ;;  %v1598_v23 = vadd.f32 %v1597_v54, %v3674_v15  ;;  %v1638_v61 = vadd.f32 %v1637_v28, %v3674_v15 }
 0x2c2   : > { %v1599_v45 = vpop.f32.mrf.mxu0  ;;  %v1639_v60 = vpop.f32.mrf.mxu1 }
 0x2c3   : > { %v2303_v26 = vpack.c.bf16 %v1598_v23, %v1596_v25  ;;  %v2327_v39 = vpack.c.bf16 %v1638_v61, %v1636_v29  ;;  %v1600_v63 = vadd.f32 %v1599_v45, %v3671_v44  ;;  %v1640_v6 = vadd.f32 %v1639_v60, %v3671_v44 }
 0x2c4   : > { %v1601_v46 = vpop.f32.mrf.mxu0  ;;  %v1641_v62 = vpop.f32.mrf.mxu1 }
 0x2c5   : > { %1952 = vst [vmem:[%s3582_s6 + $0xa0] sm:$0xff] %v2303_v26  ;;  %1976 = vst [vmem:[%s3582_s6 + $0x160] sm:$0xff] %v2327_v39  ;;  %v1602_v14 = vadd.f32 %v1601_v46, %v3674_v15  ;;  %v1642_v37 = vadd.f32 %v1641_v62, %v3674_v15 }
 0x2c7   : > { %v2306_v52 = vpack.c.bf16 %v1602_v14, %v1600_v63  ;;  %v2330_v17 = vpack.c.bf16 %v1642_v37, %v1640_v6 }
 0x2c9   : > { %1955 = vst [vmem:[%s3582_s6 + $0xb8] sm:$0xff] %v2306_v52  ;;  %1979 = vst [vmem:[%s3582_s6 + $0x178] sm:$0xff] %v2330_v17 }
 0x2ca   : > { %2776 = shalt.err (!%p2773_p11)
}
 0x2cb   : > { %s2777_s16 = scalar_lea.hbm %s3738_s11, 6144  ;;  %s2781_s1 = scalar_lea.hbm %s3798_s5, 24576 }
 0x2cc   : > { %p2778_p5 = scmp.ne.s32.totalorder %s3738_s11, %s2777_s16  ;;  %p2782_p12 = scmp.lt.s32.totalorder %s3738_s11, %s3798_s5 }
 0x2cd   : > { %p2783_p10 = scmp.lt.s32.totalorder %s2781_s1, %s2777_s16 }
 0x2ce   : > { %p2779_p7 = pnand %p2778_p5, %p3032_p13 }
 0x2cf   : > { %p2784_p0 = por %p2783_p10, %p2782_p12 }
 0x2d0   : > { %p2780_p9 = pneg %p2779_p7 }
 0x2d2   : > { %p2785_p1 = pnand %p2784_p0, %p2780_p9 }
 0x2d4   : > { %2788 = shalt.err (!%p2785_p1)
}
 0x2d5   : > { %s2878_s6 = smov 384   ;;  %s2879_s7 = smov 24  }
 0x2d6   : > { %2380 = dma.vmem_to_hbm [thread:$0]  (%p3032_p13), %s3733_s22, 6144, %s3738_s11, %s1981_s26, %s2878_s6, %s2878_s6, %s2879_s7  }
 0x2d7 PF: > { %s3830_s29 = sld [smem:[#allocation15_spill]]  ;;  %p2407_p6 = scmp.ge.s32.totalorder %s2867_s25, 2 }
 0x2d8   : > { %s3831_s21 = sld [smem:[#allocation17_spill]] }
 0x2dd   : > { %s2012_s15 = sand.u32 1, %s3830_s29  }
 0x2de   : > { %p3832_p3 = scmp.ne.s32.totalorder %s3831_s21, 0  ;;  %s2013_s27 = scalar_lea.sflag [#allocation4], %s2012_s15 }
 0x2e0   : > { %p2397_p4 = pnand %p2407_p6, %p3832_p3 }
 0x2e2   : > { %p2398_p2 = pneg %p2397_p4 }
 0x2e4   : > { %2834 = dma.done.wait (%p2398_p2), %s2013_s27, 6144  }
 0x2e5   : > { %2836 = vsyncadd (%p2398_p2), %s2013_s27, 4294961152  ;;  %s23_s25 = sadd.s32 1, %s2867_s25   ;;  %s3833_s21 = sld [smem:[#allocation16_spill]] }
 0x2e6   : > { %p20_p8 = scmp.ge.s32.totalorder %s23_s25, 6   ;;  %s3834_s23 = sld [smem:[#allocation18_spill]] }
 0x2e7   : > { %s3835_s18 = smov %s2843_s19  ;;  %s3836_s19 = smov %s2847_s20 }
 0x2e8   : > { %s3837_s20 = smov %s3049_s2  ;;  %s3838_s22 = smov %s2863_s24 }
 0x2e9   : > { %s3839_s24 = smov %s3845_s17  ;;  %22 = sbr.rel (!%p20_p8) target bundleno = 13 (0xd), region = 97 }
 0x2ee   :  { %2018 = vsyncpa [#allocation3], 1 }
 0x2ef   :  { %2020 = vsyncpa [#allocation3 + $0x1], 1 }
 0x2f0   :  { %2021 = vsyncpa [#allocation6], 1 }
 0x2f1   :  { %2022 = vsyncpa [#allocation9], 1 }
 0x2f2   :  { %2023 = vsyncpa [#allocation4], 1 }
 0x2f3   :  { %2025 = vsyncpa [#allocation4 + $0x1], 1 }

</bundles_post_ra>
